<compile_context>
chip_gen: v7x
topology: tpu7x:2x2x1
jax: 0.10.0
libtpu: 0.0.40
codegen_flags: <defaults>
</compile_context>

<pallas_src>
import jax
import jax.numpy as jnp
from jax.experimental import pallas as pl
from jax.experimental.pallas import tpu as pltpu


def _round_up(x, m):
    return (x + m - 1) // m * m


def skip_gram_kernel(center_ref, ctx_ref, ev_ref, eu_ref, out_ref):
    """One grid step == one batch tile of TB center words.

    center_ref : VMEM (TB, 1)   int32   -- center word ids
    ctx_ref    : VMEM (TB, Lp)  int32   -- context/negative ids (L padded to Lp)
    ev_ref     : VMEM (V, E)    float32 -- embed_v.weight (full table)
    eu_ref     : VMEM (V, E)    float32 -- embed_u.weight (full table)
    out_ref    : VMEM (TB, Lp)  float32 -- lane-dense score slab
    """
    tb = center_ref.shape[0]
    lp = ctx_ref.shape[1]
    vocab = ev_ref.shape[0]

    f32 = jnp.float32
    hi = jax.lax.Precision.HIGHEST

    # --- gather the TB center embeddings via a one-hot MXU matmul ----------
    c_ids = center_ref[...]                                       # (TB, 1)
    col = jax.lax.broadcasted_iota(jnp.int32, (tb, vocab), 1)     # (TB, V)
    c_onehot = (col == c_ids).astype(f32)                         # (TB, V)
    v = jnp.dot(c_onehot, ev_ref[...],
                precision=hi, preferred_element_type=f32)         # (TB, E)

    # --- scores of every center against the whole u-table, on the MXU ------
    # S[b, w] = <v_b, embed_u[w]>
    s = jax.lax.dot_general(
        v, eu_ref[...],
        dimension_numbers=(((1,), (1,)), ((), ())),
        precision=hi, preferred_element_type=f32)                 # (TB, V)

    # --- select the requested (padded) L columns per row --------------------
    ctx = ctx_ref[...]                                            # (TB, Lp)
    wid = jax.lax.broadcasted_iota(jnp.int32, (tb, lp, vocab), 2) # (TB, Lp, V)
    sel = wid == ctx[:, :, None]                                  # (TB, Lp, V)
    pred = jnp.sum(jnp.where(sel, s[:, None, :], 0.0), axis=-1)   # (TB, Lp)

    out_ref[...] = pred.astype(out_ref.dtype)


def skip_gram_pallas(center, contexts_and_negatives, embed_v_weight,
                     embed_u_weight, *, block_b=128):
    """Forward pass of SkipGramModel: returns (B, 1, L) scores."""
    B = center.shape[0]
    L = contexts_and_negatives.shape[1]
    V, E = embed_v_weight.shape

    TB = min(block_b, _round_up(B, 8))        # batch tile (sublane-aligned)
    Bp = _round_up(B, TB)                     # padded batch
    Lp = _round_up(L, 128)                    # lane-dense output width

    center_p = jnp.pad(center.astype(jnp.int32), ((0, Bp - B), (0, 0)))
    ctx_p = jnp.pad(contexts_and_negatives.astype(jnp.int32),
                    ((0, Bp - B), (0, Lp - L)))

    out = pl.pallas_call(
        skip_gram_kernel,
        out_shape=jax.ShapeDtypeStruct((Bp, Lp), jnp.float32),
        grid=(Bp // TB,),
        in_specs=[
            pl.BlockSpec((TB, 1), lambda i: (i, 0)),
            pl.BlockSpec((TB, Lp), lambda i: (i, 0)),
            # Full embedding tables resident in VMEM (fine for this small
            # synthetic vocab).
            # TODO(synk): for production vocab sizes keep the tables in HBM
            # (memory_space=pl.ANY) and DMA only the rows each tile needs,
            # or store them as bf16 to halve VMEM/HBM traffic.
            pl.BlockSpec((V, E), lambda i: (0, 0)),
            pl.BlockSpec((V, E), lambda i: (0, 0)),
        ],
        out_specs=pl.BlockSpec((TB, Lp), lambda i: (i, 0)),
        compiler_params=pltpu.CompilerParams(
            dimension_semantics=("parallel",),
            vmem_limit_bytes=64 * 1024 * 1024),
    )(center_p, ctx_p, embed_v_weight, embed_u_weight)

    # (Bp, Lp) lane-dense slab -> (B, 1, L), matching torch.bmm output.
    return out[:B, :L].reshape(B, 1, L)


if __name__ == "__main__":
    # Small shapes consistent with the module's forward.
    VOCAB = 64      # vocab_size
    EMBED = 128     # embed_size (lane-aligned)
    B = 2           # batch
    L = 8           # num contexts + negatives per center word

    key = jax.random.PRNGKey(0)
    k_ev, k_eu, k_c, k_ctx = jax.random.split(key, 4)

    # nn.Embedding default init: N(0, 1)
    embed_v_weight = jax.random.normal(k_ev, (VOCAB, EMBED), dtype=jnp.float32)
    embed_u_weight = jax.random.normal(k_eu, (VOCAB, EMBED), dtype=jnp.float32)

    center = jax.random.randint(k_c, (B, 1), 0, VOCAB, dtype=jnp.int32)
    contexts = jax.random.randint(k_ctx, (B, L), 0, VOCAB, dtype=jnp.int32)

    pred = skip_gram_pallas(center, contexts, embed_v_weight, embed_u_weight)
    pred = jax.block_until_ready(pred)

    # Pure-JAX reference of the PyTorch forward.
    v_ref = embed_v_weight[center]            # (B, 1, E)
    u_ref = embed_u_weight[contexts]          # (B, L, E)
    pred_ref = jnp.einsum("bie,ble->bil", v_ref, u_ref,
                          precision=jax.lax.Precision.HIGHEST)

    assert pred.shape == (B, 1, L), pred.shape
    assert jnp.allclose(pred, pred_ref, atol=1e-4, rtol=1e-4), (
        jnp.max(jnp.abs(pred - pred_ref)))

    print("KERNEL_OK")
</pallas_src>

<mosaic_0001>
module attributes {stable_mosaic.version = 11 : i64} {
  func.func @skip_gram_kernel(%arg0: i32, %arg1: memref<8x1xi32, #tpu.memory_space<vmem>>, %arg2: memref<8x128xi32, #tpu.memory_space<vmem>>, %arg3: memref<64x128xf32, #tpu.memory_space<vmem>>, %arg4: memref<64x128xf32, #tpu.memory_space<vmem>>, %arg5: memref<8x128xf32, #tpu.memory_space<vmem>>) attributes {dimension_semantics = [#tpu.dimension_semantics<parallel>], iteration_bounds = array<i64: 1>, scalar_prefetch = 0 : i64, scratch_operands = 0 : i64, tpu.core_type = #tpu.core_type<tc>, window_params = [{transform_indices = @transform_0, window_bounds = array<i64: 8, 1>}, {transform_indices = @transform_1, window_bounds = array<i64: 8, 128>}, {pipeline_mode = #tpu.pipeline_mode<synchronous>, transform_indices = @transform_2, window_bounds = array<i64: 64, 128>}, {pipeline_mode = #tpu.pipeline_mode<synchronous>, transform_indices = @transform_3, window_bounds = array<i64: 64, 128>}, {transform_indices = @transform_4, window_bounds = array<i64: 8, 128>}]} {
    %c0 = arith.constant 0 : index
    %c0_0 = arith.constant 0 : index
    %0 = vector.load %arg1[%c0, %c0_0] : memref<8x1xi32, #tpu.memory_space<vmem>>, vector<8x1xi32>
    %1 = tpu.iota {dimensions = array<i32: 1>} : vector<8x64xi32>
    %2 = vector.broadcast %0 : vector<8x1xi32> to vector<8x64xi32>
    %3 = arith.cmpi eq, %1, %2 : vector<8x64xi32>
    %4 = arith.extui %3 : vector<8x64xi1> to vector<8x64xi32>
    %5 = arith.sitofp %4 : vector<8x64xi32> to vector<8x64xf32>
    %c0_1 = arith.constant 0 : index
    %c0_2 = arith.constant 0 : index
    %6 = vector.load %arg3[%c0_1, %c0_2] : memref<64x128xf32, #tpu.memory_space<vmem>>, vector<64x128xf32>
    %cst = arith.constant dense<0.000000e+00> : vector<8x128xf32>
    %7 = tpu.matmul %5, %6, %cst {dimension_numbers = #tpu.dot_dimension_numbers<[1], [0], [0], [1], [0, 0, 1, 1], [], []>, precision = #tpu.contract_precision<fp32>} : vector<8x64xf32>, vector<64x128xf32>, vector<8x128xf32> -> vector<8x128xf32>
    %c0_3 = arith.constant 0 : index
    %c0_4 = arith.constant 0 : index
    %8 = vector.load %arg4[%c0_3, %c0_4] : memref<64x128xf32, #tpu.memory_space<vmem>>, vector<64x128xf32>
    %cst_5 = arith.constant dense<0.000000e+00> : vector<8x64xf32>
    %9 = tpu.matmul %7, %8, %cst_5 {dimension_numbers = #tpu.dot_dimension_numbers<[1], [1], [0], [0], [0, 0, 1, 0], [], []>, precision = #tpu.contract_precision<fp32>} : vector<8x128xf32>, vector<64x128xf32>, vector<8x64xf32> -> vector<8x64xf32>
    %c0_6 = arith.constant 0 : index
    %c0_7 = arith.constant 0 : index
    %10 = vector.load %arg2[%c0_6, %c0_7] : memref<8x128xi32, #tpu.memory_space<vmem>>, vector<8x128xi32>
    %11 = tpu.iota {dimensions = array<i32: 2>} : vector<8x128x64xi32>
    %12 = vector.shape_cast %10 : vector<8x128xi32> to vector<8x128x1xi32>
    %13 = vector.broadcast %12 : vector<8x128x1xi32> to vector<8x128x64xi32>
    %14 = arith.cmpi eq, %11, %13 : vector<8x128x64xi32>
    %15 = vector.shape_cast %9 : vector<8x64xf32> to vector<8x1x64xf32>
    %cst_8 = arith.constant 0.000000e+00 : f32
    %16 = vector.shape_cast %15 : vector<8x1x64xf32> to vector<8x1x64xf32>
    %17 = vector.broadcast %16 : vector<8x1x64xf32> to vector<8x128x64xf32>
    %18 = vector.broadcast %cst_8 : f32 to vector<8x128x64xf32>
    %19 = arith.select %14, %17, %18 : vector<8x128x64xi1>, vector<8x128x64xf32>
    %cst_9 = arith.constant dense<0.000000e+00> : vector<8x128xf32>
    %20 = vector.multi_reduction <add>, %19, %cst_9 [2] : vector<8x128x64xf32> to vector<8x128xf32>
    %c0_10 = arith.constant 0 : index
    %c0_11 = arith.constant 0 : index
    %21 = vector.load %arg5[%c0_10, %c0_11] : memref<8x128xf32, #tpu.memory_space<vmem>>, vector<8x128xf32>
    tpu.vector_store %arg5[%c0_10, %c0_11], %20 {strides = array<i32>} : memref<8x128xf32, #tpu.memory_space<vmem>>, vector<8x128xf32>,
    return
  }
  func.func @transform_0(%arg0: i32) -> (i32, i32) {
    %c0_i32 = arith.constant 0 : i32
    %c0_i32_0 = arith.constant 0 : i32
    return %arg0, %c0_i32 : i32, i32
  }
  func.func @transform_1(%arg0: i32) -> (i32, i32) {
    %c0_i32 = arith.constant 0 : i32
    %c0_i32_0 = arith.constant 0 : i32
    return %arg0, %c0_i32 : i32, i32
  }
  func.func @transform_2(%arg0: i32) -> (i32, i32) {
    %c0_i32 = arith.constant 0 : i32
    %c0_i32_0 = arith.constant 0 : i32
    %c0_i32_1 = arith.constant 0 : i32
    return %c0_i32, %c0_i32_0 : i32, i32
  }
  func.func @transform_3(%arg0: i32) -> (i32, i32) {
    %c0_i32 = arith.constant 0 : i32
    %c0_i32_0 = arith.constant 0 : i32
    %c0_i32_1 = arith.constant 0 : i32
    return %c0_i32, %c0_i32_0 : i32, i32
  }
  func.func @transform_4(%arg0: i32) -> (i32, i32) {
    %c0_i32 = arith.constant 0 : i32
    %c0_i32_0 = arith.constant 0 : i32
    return %arg0, %c0_i32 : i32, i32
  }
}

</mosaic_0001>

<bundles_post_ra>
// kernel: tpu_custom_call.1
= control target key start
LH: loop header
LB: loop body
LE: loop exit
PB: predicated region body
PF: predicated region fallthrough
CT: control target
= control target key end

     0   :  { %9 = vsyncpa [#allocation3], 0  ;;  %s5498_s0 = inlined_call_operand.hbm [shape: s32[8,1], index: 0, kind: input, shape index: {}]   ;;  %s5499_s1 = inlined_call_operand.hbm [shape: s32[8,128], index: 1, kind: input, shape index: {}]   ;;  %s5500_s2 = inlined_call_operand.hbm [shape: f32[64,128], index: 2, kind: input, shape index: {}]   ;;  %s5501_s3 = inlined_call_operand.hbm [shape: f32[64,128], index: 3, kind: input, shape index: {}]   ;;  %s5502_s4 = inlined_call_operand.hbm [shape: f32[8,128], index: 4, kind: output, shape index: {}]  }
   0x1   :  { %10 = vsyncpa [#allocation6], 0 }
   0x2   :  { %11 = vsyncpa [#allocation9], 0 }
   0x3   :  { %12 = vsyncpa [#allocation4], 0  ;;  %s3896_s15 = smov [#allocation5]   ;;  %s3897_s17 = smov [#allocation2]  }
   0x4   :  { %s29_s16 = sshll.u32 %s3896_s15, 4  ;;  %s19_s18 = sshll.u32 %s3897_s17, 4  ;;  %s30_s16 = int_to_ptr.vmem [resolvable:$true] %s29_s16  ;;  %s20_s18 = int_to_ptr.vmem [resolvable:$true] %s19_s18 }
   0x5   :  { %s3778_s21 = scalar_lea.hbm %s5499_s1, 128 }
   0x6   :  { %p3779_p0 = scmp.ne.s32.totalorder %s5499_s1, %s3778_s21  ;;  %p3782_p1 = scmp.lt.u32.totalorder %s3778_s21, %s5499_s1 }
   0x8   :  { %p3784_p2 = pnand %p3782_p1, %p3779_p0 }
   0xa   :  { %3787 = shalt.err (!%p3784_p2)
}
   0xb   :  { %s3788_s26 = scalar_lea.vmem %s30_s16, 128  ;;  %p3793_p4 = scmp.lt.s32.totalorder %s30_s16, %s30_s16 }
   0xc   :  { %p3789_p3 = scmp.ne.s32.totalorder %s30_s16, %s3788_s26  ;;  %p3794_p5 = scmp.lt.s32.totalorder %s3788_s26, %s3788_s26 }
   0xe   :  { %p3795_p6 = por %p3794_p5, %p3793_p4 }
  0x10   :  { %p3796_p7 = pnand %p3795_p6, %p3789_p3 }
  0x12   :  { %3799 = shalt.err (!%p3796_p7)
}
  0x13   :  { %32 = dma.hbm_to_vmem [thread:$0]  %s5499_s1, 128, %s30_s16, [#allocation6]  }
  0x14   :  { %s3800_s5 = scalar_lea.hbm %s5498_s0, 128 }
  0x15   :  { %p3801_p8 = scmp.ne.s32.totalorder %s5498_s0, %s3800_s5  ;;  %p3804_p9 = scmp.lt.u32.totalorder %s3800_s5, %s5498_s0 }
  0x17   :  { %p3806_p10 = pnand %p3804_p9, %p3801_p8 }
  0x19   :  { %3809 = shalt.err (!%p3806_p10)
}
  0x1a   :  { %s3810_s10 = scalar_lea.vmem %s20_s18, 128  ;;  %p3815_p12 = scmp.lt.s32.totalorder %s20_s18, %s20_s18 }
  0x1b   :  { %p3811_p11 = scmp.ne.s32.totalorder %s20_s18, %s3810_s10  ;;  %p3816_p13 = scmp.lt.s32.totalorder %s3810_s10, %s3810_s10 }
  0x1d   :  { %p3817_p0 = por %p3816_p13, %p3815_p12 }
  0x1f   :  { %p3818_p1 = pnand %p3817_p0, %p3811_p11 }
  0x21   :  { %3821 = shalt.err (!%p3818_p1)
}
  0x22   :  { %22 = dma.hbm_to_vmem [thread:$0]  %s5498_s0, 128, %s20_s18, [#allocation3]  }
  0x23   :  { %s3898_s12 = smov [#allocation7]   ;;  %s3822_s16 = scalar_lea.hbm %s5500_s2, 1024 }
  0x24   :  { %s38_s13 = sshll.u32 %s3898_s12, 4  ;;  %p3823_p2 = scmp.ne.s32.totalorder %s5500_s2, %s3822_s16  ;;  %s39_s13 = int_to_ptr.vmem [resolvable:$true] %s38_s13 }
  0x25   :  { %p3826_p3 = scmp.lt.u32.totalorder %s3822_s16, %s5500_s2 }
  0x27   :  { %p3828_p4 = pnand %p3826_p3, %p3823_p2 }
  0x29   :  { %3831 = shalt.err (!%p3828_p4)
}
  0x2a   :  { %s3832_s22 = scalar_lea.vmem %s39_s13, 1024  ;;  %p3837_p6 = scmp.lt.s32.totalorder %s39_s13, %s39_s13 }
  0x2b   :  { %p3833_p5 = scmp.ne.s32.totalorder %s39_s13, %s3832_s22  ;;  %p3838_p7 = scmp.lt.s32.totalorder %s3832_s22, %s3832_s22 }
  0x2d   :  { %p3839_p8 = por %p3838_p7, %p3837_p6 }
  0x2f   :  { %p3840_p9 = pnand %p3839_p8, %p3833_p5 }
  0x31   :  { %3843 = shalt.err (!%p3840_p9)
}
  0x32   :  { %s3899_s0 = smov 128   ;;  %s3900_s18 = smov 8  }
  0x33   :  { %44 = dma.hbm_to_vmem [thread:$0]  %s5500_s2, 1024, %s39_s13, [#allocation6], %s3899_s0, %s3899_s0, %s3900_s18  }
  0x34   :  { %s3901_s25 = smov [#allocation8]   ;;  %s3844_s29 = scalar_lea.hbm %s5501_s3, 1024 }
  0x35   :  { %s50_s26 = sshll.u32 %s3901_s25, 4  ;;  %p3845_p10 = scmp.ne.s32.totalorder %s5501_s3, %s3844_s29  ;;  %s51_s26 = int_to_ptr.vmem [resolvable:$true] %s50_s26 }
  0x36   :  { %p3848_p11 = scmp.lt.u32.totalorder %s3844_s29, %s5501_s3 }
  0x38   :  { %p3850_p12 = pnand %p3848_p11, %p3845_p10 }
  0x3a   :  { %3853 = shalt.err (!%p3850_p12)
}
  0x3b   :  { %s3854_s8 = scalar_lea.vmem %s51_s26, 1024  ;;  %p3859_p0 = scmp.lt.s32.totalorder %s51_s26, %s51_s26 }
  0x3c   :  { %p3855_p13 = scmp.ne.s32.totalorder %s51_s26, %s3854_s8  ;;  %p3860_p1 = scmp.lt.s32.totalorder %s3854_s8, %s3854_s8 }
  0x3e   :  { %p3861_p2 = por %p3860_p1, %p3859_p0 }
  0x40   :  { %p3862_p3 = pnand %p3861_p2, %p3855_p13 }
  0x42   :  { %3865 = shalt.err (!%p3862_p3)
}
  0x43   :  { %56 = dma.hbm_to_vmem [thread:$0]  %s5501_s3, 1024, %s51_s26, [#allocation9], %s3899_s0, %s3899_s0, %s3900_s18  }
  0x44   :  { %3888 = dma.done.wait [#allocation3], 128  }
  0x45   :  { %3889 = vsyncadd [#allocation3], 4294967168 }
  0x46   :  { %3890 = dma.done.wait [#allocation6], 1152  }
  0x47   :  { %3891 = vsyncadd [#allocation6], 4294966144 }
  0x48   :  { %3892 = dma.done.wait [#allocation9], 1024  }
  0x49   :  { %3893 = vsyncadd [#allocation9], 4294966272  ;;  %v3902_v0 = vmov 0   ;;  %v3903_v1 = vmov 0.0|0.0   ;;  %v69_v2 = vld [vmem:[#allocation2] sm:$0xff]  ;;  %v78_v3 = vld [vmem:[#allocation7] sm:$0xff] }
  0x4a   :  { %3777 = vset.pattern.permute.xlu0 %v3902_v0  ;;  %3602 = vmatprep.subr.bf16.mxu0 %v3903_v1  ;;  %v79_v4 = vld [vmem:[#allocation7 + $0x8] sm:$0xff]  ;;  %v91_v5 = vand.u32 4294901760, %v78_v3  ;;  %v80_v7 = vld [vmem:[#allocation7 + $0x10] sm:$0xff]  ;;  %v81_v8 = vld [vmem:[#allocation7 + $0x18] sm:$0xff]  ;;  %vm3904_vm0 = vmmov 0   ;;  %v3905_v31 = vmov 0.0  }
  0x4b   :  { %3686 = vmatprep.subr.bf16.mxu1 %v3903_v1  ;;  %73 = vperm.xlu0 %3777, %v69_v2   ;;  %v94_v6 = vand.u32 4294901760, %v79_v4  ;;  %v82_v9 = vld [vmem:[#allocation7 + $0x20] sm:$0xff]  ;;  %v97_v10 = vand.u32 4294901760, %v80_v7  ;;  %v100_v11 = vand.u32 4294901760, %v81_v8  ;;  %v83_v12 = vld [vmem:[#allocation7 + $0x28] sm:$0xff]  ;;  %v84_v18 = vld [vmem:[#allocation7 + $0x30] sm:$0xff] }
  0x4c   :  { %v103_v13 = vand.u32 4294901760, %v82_v9  ;;  %v3985_v15 = vsub.f32 %v78_v3, %v91_v5  ;;  %v106_v17 = vand.u32 4294901760, %v83_v12  ;;  %v85_v19 = vld [vmem:[#allocation7 + $0x38] sm:$0xff]  ;;  %v109_v25 = vand.u32 4294901760, %v84_v18  ;;  %3390 = vmatprep.mubr.msk.f32.mxu0 %vm3904_vm0, %v3905_v31  ;;  %3523 = vmatprep.mubr.msk.f32.mxu1 %vm3904_vm0, %v3905_v31  ;;  %s3907_s3 = smov [#allocation10]  }
  0x4d   :  { %v3983_v14 = vpack.c.bf16 %v94_v6, %v91_v5  ;;  %v3987_v16 = vsub.f32 %v79_v4, %v94_v6  ;;  %v3989_v20 = vsub.f32 %v80_v7, %v97_v10  ;;  %v3991_v21 = vsub.f32 %v81_v8, %v100_v11  ;;  %v627_v5 = vld [vmem:[#allocation8] sm:$0xff]  ;;  %v628_v6 = vld [vmem:[#allocation8 + $0x8] sm:$0xff]  ;;  %v629_v7 = vld [vmem:[#allocation8 + $0x10] sm:$0xff]  ;;  %s3251_s10 = sshll.u32 %s3907_s3, 4  ;;  %s3252_s10 = int_to_ptr.vmem [resolvable:$true] %s3251_s10 }
  0x4e   :  { %v3993_v22 = vsub.f32 %v82_v9, %v103_v13  ;;  %v3996_v23 = vpack.c.bf16 %v100_v11, %v97_v10  ;;  %v3998_v24 = vsub.f32 %v83_v12, %v106_v17  ;;  %v112_v26 = vand.u32 4294901760, %v85_v19  ;;  %v630_v10 = vld [vmem:[#allocation8 + $0x18] sm:$0xff]  ;;  %s3866_s1 = scalar_lea.vmem %s3252_s10, 128  ;;  %p3871_p5 = scmp.lt.s32.totalorder %s3252_s10, %s3252_s10 }
  0x4f   :  { %3604 = vmatpush3.bf16.msra.mxu0 %v3983_v14  ;;  %v176_v27 = vand.u32 4294901760, %v3985_v15  ;;  %v183_v28 = vand.u32 4294901760, %v3987_v16  ;;  %v4003_v29 = vsub.f32 %v84_v18, %v109_v25  ;;  %v4014_v34 = vpack.c.bf16 %v106_v17, %v103_v13  ;;  %p3867_p4 = scmp.ne.s32.totalorder %s3252_s10, %s3866_s1  ;;  %p3872_p6 = scmp.lt.s32.totalorder %s3866_s1, %s3866_s1 }
  0x50   :  { %3605 = vmatprep.subr.bf16.mxu0 %v3903_v1  ;;  %v4005_v30 = vsub.f32 %v85_v19, %v112_v26  ;;  %v190_v35 = vand.u32 4294901760, %v3989_v20  ;;  %v197_v36 = vand.u32 4294901760, %v3991_v21  ;;  %v4021_v41 = vpack.c.bf16 %v112_v26, %v109_v25 }
  0x51   :  { %v177_v32 = vsub.f32 %v3985_v15, %v176_v27  ;;  %v184_v33 = vsub.f32 %v3987_v16, %v183_v28  ;;  %v204_v45 = vand.u32 4294901760, %v3993_v22  ;;  %v211_v46 = vand.u32 4294901760, %v3998_v24  ;;  %p3873_p7 = por %p3872_p6, %p3871_p5 }
  0x52   :  { %v191_v39 = vsub.f32 %v3989_v20, %v190_v35  ;;  %v198_v40 = vsub.f32 %v3991_v21, %v197_v36  ;;  %v218_v52 = vand.u32 4294901760, %v4003_v29  ;;  %v225_v53 = vand.u32 4294901760, %v4005_v30 }
  0x53   :  { %3607 = vmatpush3.bf16.msra.mxu0 %v3996_v23  ;;  %v178_v37 = vand.u32 4294901760, %v177_v32  ;;  %v185_v38 = vand.u32 4294901760, %v184_v33  ;;  %v205_v48 = vsub.f32 %v3993_v22, %v204_v45  ;;  %v212_v49 = vsub.f32 %v3998_v24, %v211_v46  ;;  %p3874_p8 = pnand %p3873_p7, %p3867_p4 }
  0x54   :  { %3608 = vmatprep.subr.bf16.mxu0 %v3903_v1  ;;  %v192_v43 = vand.u32 4294901760, %v191_v39  ;;  %v199_v44 = vand.u32 4294901760, %v198_v40  ;;  %v219_v55 = vsub.f32 %v4003_v29, %v218_v52  ;;  %v226_v56 = vsub.f32 %v4005_v30, %v225_v53 }
  0x55   :  { %v4023_v42 = vpack.c.bf16 %v185_v38, %v178_v37  ;;  %v206_v50 = vand.u32 4294901760, %v205_v48  ;;  %v213_v51 = vand.u32 4294901760, %v212_v49  ;;  %v3627_v60 = vpack.c.bf16 %v3987_v16, %v3985_v15  ;;  %v631_v37 = vld [vmem:[#allocation8 + $0x20] sm:$0xff]  ;;  %v632_v38 = vld [vmem:[#allocation8 + $0x28] sm:$0xff] }
  0x56   :  { %v4029_v47 = vpack.c.bf16 %v199_v44, %v192_v43  ;;  %v220_v57 = vand.u32 4294901760, %v219_v55  ;;  %v227_v58 = vand.u32 4294901760, %v226_v56  ;;  %v3630_v61 = vpack.c.bf16 %v3991_v21, %v3989_v20 }
  0x57   :  { %3610 = vmatpush3.bf16.msra.mxu0 %v4014_v34  ;;  %v4037_v54 = vpack.c.bf16 %v213_v51, %v206_v50  ;;  %v3633_v62 = vpack.c.bf16 %v3998_v24, %v3993_v22  ;;  %v3636_v63 = vpack.c.bf16 %v4005_v30, %v4003_v29  ;;  %v4051_v0 = vpack.c.bf16 %v183_v28, %v176_v27 }
  0x58   :  { %3611 = vmatprep.subr.bf16.mxu0 %v3903_v1  ;;  %v4041_v59 = vpack.c.bf16 %v227_v58, %v220_v57  ;;  %v4053_v2 = vpack.c.bf16 %v197_v36, %v190_v35  ;;  %v4055_v3 = vpack.c.bf16 %v211_v46, %v204_v45  ;;  %v4057_v4 = vpack.c.bf16 %v225_v53, %v218_v52  ;;  %v4084_v45 = vld [vmem:[#allocation5] sm:$0xff] }
  0x59   :  { %v636_v8 = vand.u32 4294901760, %v627_v5  ;;  %v639_v9 = vand.u32 4294901760, %v628_v6  ;;  %v642_v11 = vand.u32 4294901760, %v629_v7  ;;  %v645_v12 = vand.u32 4294901760, %v630_v10 }
  0x5a   :  { %v70_v26 = vlaneseq  ;;  %v648_v43 = vand.u32 4294901760, %v631_v37  ;;  %v651_v44 = vand.u32 4294901760, %v632_v38  ;;  %vm86_vm1 = vcmask 523264  }
  0x5b   :  { %3613 = vmatpush3.bf16.msra.mxu0 %v4021_v41  ;;  %v4059_v13 = vsub.f32 %v627_v5, %v636_v8  ;;  %v4061_v17 = vsub.f32 %v628_v6, %v639_v9  ;;  %v4063_v18 = vsub.f32 %v629_v7, %v642_v11  ;;  %v4065_v19 = vpack.c.bf16 %v639_v9, %v636_v8  ;;  %v4103_v7 = vld [vmem:[#allocation8 + $0x30] sm:$0xff]  ;;  %v4105_v8 = vld [vmem:[#allocation8 + $0x38] sm:$0xff] }
  0x5c   :  { %3614 = vmatprep.subr.bf16.mxu0 %v3903_v1  ;;  %v4067_v25 = vsub.f32 %v630_v10, %v645_v12  ;;  %v4079_v39 = vshrl.u32 %v70_v26, 7  ;;  %v4086_v46 = vpack.c.bf16 %v645_v12, %v642_v11  ;;  %v4094_v52 = vsub.f32 %v631_v37, %v648_v43 }
  0x5d   :  { %v721_v27 = vand.u32 4294901760, %v4059_v13  ;;  %v728_v28 = vand.u32 4294901760, %v4061_v17  ;;  %v735_v32 = vand.u32 4294901760, %v4063_v18  ;;  %v4096_v53 = vsub.f32 %v632_v38, %v651_v44 }
  0x5e   :  { %v742_v33 = vand.u32 4294901760, %v4067_v25  ;;  %5518 = vst [vmem:[#allocation15_spill] sm:$0xff] %v4079_v39  ;;  %v4092_v51 = vsub.s32 0, %v4079_v39  ;;  %v749_v5 = vand.u32 4294901760, %v4094_v52  ;;  %v4107_v9 = vpack.c.bf16 %v651_v44, %v648_v43 }
  0x5f   :  { %v722_v35 = vsub.f32 %v4059_v13, %v721_v27  ;;  %v729_v36 = vsub.f32 %v4061_v17, %v728_v28  ;;  %v736_v40 = vsub.f32 %v4063_v18, %v735_v32  ;;  %v756_v6 = vand.u32 4294901760, %v4096_v53 }
  0x60   :  { %v743_v50 = vsub.f32 %v4067_v25, %v742_v33  ;;  %v1176_v56 = vrot.slane %v4084_v45, %v4092_v51  ;;  %v654_v10 = vand.u32 4294901760, %v4103_v7  ;;  %v657_v11 = vand.u32 4294901760, %v4105_v8 }
  0x61   :  { %v723_v48 = vand.u32 4294901760, %v722_v35  ;;  %v730_v49 = vand.u32 4294901760, %v729_v36  ;;  %v737_v57 = vand.u32 4294901760, %v736_v40  ;;  %v750_v35 = vsub.f32 %v4094_v52, %v749_v5 }
  0x62   :  { %v744_v58 = vand.u32 4294901760, %v743_v50  ;;  %1182 = vbcast.lane.b32.xlu1 %v1176_v56, 264  ;;  %1178 = vbcast.lane.b32.xlu0 %v1176_v56, 256  ;;  %v757_v36 = vsub.f32 %v4096_v53, %v756_v6  ;;  %v4120_v37 = vsub.f32 %v4103_v7, %v654_v10  ;;  %v4125_v38 = vsub.f32 %v4105_v8, %v657_v11 }
  0x63   :  { %v3687_v55 = vpack.c.bf16 %v730_v49, %v723_v48  ;;  %v751_v40 = vand.u32 4294901760, %v750_v35  ;;  %v1242_v15 = vsub.s32 1, %v4079_v39  ;;  %v1309_v20 = vsub.s32 2, %v4079_v39 }
  0x64   :  { %v3690_v12 = vpack.c.bf16 %v744_v58, %v737_v57  ;;  %v758_v43 = vand.u32 4294901760, %v757_v36  ;;  %v763_v44 = vand.u32 4294901760, %v4120_v37  ;;  %v770_v48 = vand.u32 4294901760, %v4125_v38 }
  0x65   :  { %3688 = vmatpush3.bf16.xpose.msra.mxu1 %v3687_v55  ;;  %v1243_v16 = vrot.slane %v4084_v45, %v1242_v15  ;;  %v1310_v21 = vrot.slane %v4084_v45, %v1309_v20  ;;  %v1376_v22 = vsub.s32 3, %v4079_v39  ;;  %v1443_v24 = vsub.s32 4, %v4079_v39 }
  0x66   :  { %3689 = vmatprep.subr.bf16.mxu1 %v3903_v1  ;;  %1186 = vbcast.lane.b32.xlu1 %v1176_v56, 272  ;;  %v3693_v49 = vpack.c.bf16 %v758_v43, %v751_v40  ;;  %v764_v50 = vsub.f32 %v4120_v37, %v763_v44  ;;  %v771_v55 = vsub.f32 %v4125_v38, %v770_v48  ;;  %v1644_v15 = vsub.s32 7, %v4079_v39 }
  0x67   :  { %1190 = vbcast.lane.b32.xlu0 %v1176_v56, 280  ;;  %v1444_v29 = vrot.slane %v4084_v45, %v1443_v24 }
  0x68   :  { %v765_v57 = vand.u32 4294901760, %v764_v50  ;;  %v772_v58 = vand.u32 4294901760, %v771_v55 }
  0x6a   :  { %1194 = vbcast.lane.b32.xlu1 %v1176_v56, 288  ;;  %v3696_v35 = vpack.c.bf16 %v772_v58, %v765_v57 }
  0x6b   :  { %1198 = vbcast.lane.b32.xlu0 %v1176_v56, 296 }
  0x6d   :  { %3691 = vmatpush3.bf16.xpose.msra.mxu1 %v3690_v12  ;;  %v4137_v12 = vand.u32 127, %v70_v26 }
  0x6e   :  { %3692 = vmatprep.subr.bf16.mxu1 %v3903_v1  ;;  %1202 = vbcast.lane.b32.xlu1 %v1176_v56, 304 }
  0x6f   :  { %1206 = vbcast.lane.b32.xlu0 %v1176_v56, 312 }
  0x72   :  { %1210 = vbcast.lane.b32.xlu1 %v1176_v56, 320 }
  0x73   :  { %1214 = vbcast.lane.b32.xlu0 %v1176_v56, 328 }
  0x75   :  { %3694 = vmatpush3.bf16.xpose.msra.mxu1 %v3693_v49 }
  0x76   :  { %3695 = vmatprep.subr.bf16.mxu1 %v3903_v1  ;;  %1218 = vbcast.lane.b32.xlu1 %v1176_v56, 336 }
  0x77   :  { %1222 = vbcast.lane.b32.xlu0 %v1176_v56, 344 }
  0x7a   :  { %1226 = vbcast.lane.b32.xlu1 %v1176_v56, 352 }
  0x7b   :  { %1230 = vbcast.lane.b32.xlu0 %v1176_v56, 360 }
  0x7d   :  { %3697 = vmatpush3.bf16.xpose.msra.mxu1 %v3696_v35 }
  0x7e   :  { %3698 = vmatprep.subr.bf16.mxu1 %v3903_v1  ;;  %1234 = vbcast.lane.b32.xlu1 %v1176_v56, 368 }
  0x7f   :  { %1238 = vbcast.lane.b32.xlu0 %v1176_v56, 376 }
  0x82   :  { %1245 = vbcast.lane.b32.xlu1 %v1243_v16, 256 }
  0x83   :  { %1249 = vbcast.lane.b32.xlu0 %v1243_v16, 264 }
  0x86   :  { %1253 = vbcast.lane.b32.xlu1 %v1243_v16, 272 }
  0x87   :  { %1257 = vbcast.lane.b32.xlu0 %v1243_v16, 280 }
  0x8a   :  { %1261 = vbcast.lane.b32.xlu1 %v1243_v16, 288 }
  0x8b   :  { %1265 = vbcast.lane.b32.xlu0 %v1243_v16, 296 }
  0x8e   :  { %1269 = vbcast.lane.b32.xlu1 %v1243_v16, 304 }
  0x8f   :  { %1273 = vbcast.lane.b32.xlu0 %v1243_v16, 312 }
  0x92   :  { %1277 = vbcast.lane.b32.xlu1 %v1243_v16, 320 }
  0x93   :  { %1281 = vbcast.lane.b32.xlu0 %v1243_v16, 328 }
  0x96   :  { %1285 = vbcast.lane.b32.xlu1 %v1243_v16, 336 }
  0x97   :  { %1289 = vbcast.lane.b32.xlu0 %v1243_v16, 344 }
  0x9a   :  { %1293 = vbcast.lane.b32.xlu1 %v1243_v16, 352 }
  0x9b   :  { %1297 = vbcast.lane.b32.xlu0 %v1243_v16, 360 }
  0x9e   :  { %1301 = vbcast.lane.b32.xlu1 %v1243_v16, 368 }
  0x9f   :  { %1305 = vbcast.lane.b32.xlu0 %v1243_v16, 376 }
  0xa2   :  { %1312 = vbcast.lane.b32.xlu1 %v1310_v21, 256 }
  0xa3   :  { %1316 = vbcast.lane.b32.xlu0 %v1310_v21, 264 }
  0xa6   :  { %1320 = vbcast.lane.b32.xlu1 %v1310_v21, 272 }
  0xa7   :  { %1324 = vbcast.lane.b32.xlu0 %v1310_v21, 280 }
  0xaa   :  { %1328 = vbcast.lane.b32.xlu1 %v1310_v21, 288 }
  0xab   :  { %1332 = vbcast.lane.b32.xlu0 %v1310_v21, 296 }
  0xae   :  { %1336 = vbcast.lane.b32.xlu1 %v1310_v21, 304 }
  0xaf   :  { %1340 = vbcast.lane.b32.xlu0 %v1310_v21, 312 }
  0xb2   :  { %1344 = vbcast.lane.b32.xlu1 %v1310_v21, 320 }
  0xb3   :  { %1348 = vbcast.lane.b32.xlu0 %v1310_v21, 328 }
  0xb6   :  { %1352 = vbcast.lane.b32.xlu1 %v1310_v21, 336 }
  0xb7   :  { %1356 = vbcast.lane.b32.xlu0 %v1310_v21, 344 }
  0xba   :  { %1360 = vbcast.lane.b32.xlu1 %v1310_v21, 352 }
  0xbb   :  { %1364 = vbcast.lane.b32.xlu0 %v1310_v21, 360 }
  0xbe   :  { %1368 = vbcast.lane.b32.xlu1 %v1310_v21, 368 }
  0xbf   :  { %1372 = vbcast.lane.b32.xlu0 %v1310_v21, 376 }
  0xca   :  { %v74_v36 = vpop.permute.xlu0 %73 }
  0xcb   :  { %vm75_vm2 = vcmp.eq.s32.totalorder %v4137_v12, %v74_v36 }
  0xcc   :  { %v3262_v40 = vsel %vm75_vm2, 1.0, %v3905_v31 }
  0xcd   :  { %v88_v43 = vsel %vm86_vm1, %v3262_v40, 0 }
  0xce   :  { %v164_v49 = vsub.f32 %v88_v43, %v88_v43 }
  0xd0   :  { %v165_v26 = vand.u32 4294901760, %v164_v49 }
  0xd2   :  { %v166_v50 = vsub.f32 %v164_v49, %v165_v26 }
  0xd4   :  { %v167_v55 = vand.u32 4294901760, %v166_v50 }
  0xd6   :  { %3391 = vmatmul.mubr.f32.vlgmr.msra.gmra.mrb[0].mxu0 %v167_v55 }
  0xd7   :  { %3616 = vmatpush3.bf16.msra.mxu0 %v4023_v42  ;;  %3409 = vmatprep.mubr.msk.f32.mxu0 %vm3904_vm0, %v3905_v31 }
  0xd8   :  { %3617 = vmatprep.subr.bf16.mxu0 %v3903_v1 }
  0xdb   :  { %3619 = vmatpush3.bf16.msra.mxu0 %v4029_v47 }
  0xdc   :  { %3620 = vmatprep.subr.bf16.mxu0 %v3903_v1 }
  0xdf   :  { %3622 = vmatpush3.bf16.msra.mxu0 %v4037_v54 }
  0xe0   :  { %3623 = vmatprep.subr.bf16.mxu0 %v3903_v1 }
  0xe3   :  { %3625 = vmatpush3.bf16.msra.mxu0 %v4041_v59 }
  0xe4   :  { %3626 = vmatprep.subr.bf16.mxu0 %v3903_v1 }
  0xe6   :  { %3410 = vmatmul.mubr.msk.f32.vlgmr.msra.gmra.mrb[0].mxu0 %vm86_vm1, %v3262_v40 }
  0xe7   :  { %3628 = vmatpush3.bf16.msra.mxu0 %v3627_v60  ;;  %3428 = vmatprep.mubr.msk.f32.mxu0 %vm3904_vm0, %v3905_v31  ;;  %v3702_v60 = vpack.c.bf16 %v4067_v25, %v4063_v18  ;;  %v3729_v18 = vpack.c.bf16 %v756_v6, %v749_v5  ;;  %v1645_v25 = vrot.slane %v4084_v45, %v1644_v15 }
  0xe8   :  { %3629 = vmatprep.subr.bf16.mxu0 %v3903_v1 }
  0xeb   :  { %3631 = vmatpush3.bf16.msra.mxu0 %v3630_v61 }
  0xec   :  { %3632 = vmatprep.subr.bf16.mxu0 %v3903_v1 }
  0xef   :  { %3634 = vmatpush3.bf16.msra.mxu0 %v3633_v62  ;;  %v1510_v62 = vsub.s32 5, %v4079_v39 }
  0xf0   :  { %3635 = vmatprep.subr.bf16.mxu0 %v3903_v1 }
  0xf3   :  { %3637 = vmatpush3.bf16.msra.mxu0 %v3636_v63  ;;  %v3705_v63 = vpack.c.bf16 %v4096_v53, %v4094_v52  ;;  %v3732_v52 = vpack.c.bf16 %v770_v48, %v763_v44 }
  0xf4   :  { %3638 = vmatprep.subr.bf16.mxu0 %v3903_v1 }
  0xf6   :  { %3429 = vmatmul.mubr.f32.vlgmr.msra.gmra.mrb[0].mxu0 %v164_v49 }
  0xf7   :  { %3640 = vmatpush3.bf16.msra.mxu0 %v3983_v14  ;;  %3447 = vmatprep.mubr.msk.f32.mxu0 %vm3904_vm0, %v3905_v31 }
  0xf8   :  { %3641 = vmatprep.subr.bf16.mxu0 %v3903_v1 }
  0xfb   :  { %3643 = vmatpush3.bf16.msra.mxu0 %v3996_v23 }
  0xfc   :  { %3644 = vmatprep.subr.bf16.mxu0 %v3903_v1 }
  0xff   :  { %3646 = vmatpush3.bf16.msra.mxu0 %v4014_v34 }
 0x100   :  { %3647 = vmatprep.subr.bf16.mxu0 %v3903_v1 }
 0x103   :  { %3649 = vmatpush3.bf16.msra.mxu0 %v4021_v41 }
 0x104   :  { %3650 = vmatprep.subr.bf16.mxu0 %v3903_v1 }
 0x106   :  { %3448 = vmatmul.mubr.f32.vlgmr.msra.gmra.mrb[0].mxu0 %v165_v26  ;;  %v3723_v26 = vpack.c.bf16 %v728_v28, %v721_v27 }
 0x107   :  { %3652 = vmatpush3.bf16.msra.mxu0 %v4051_v0  ;;  %3466 = vmatprep.mubr.msk.f32.mxu0 %vm3904_vm0, %v3905_v31  ;;  %v1511_v0 = vrot.slane %v4084_v45, %v1510_v62 }
 0x108   :  { %3653 = vmatprep.subr.bf16.mxu0 %v3903_v1 }
 0x10b   :  { %3655 = vmatpush3.bf16.msra.mxu0 %v4053_v2  ;;  %v3708_v2 = vpack.c.bf16 %v4125_v38, %v4120_v37 }
 0x10c   :  { %3656 = vmatprep.subr.bf16.mxu0 %v3903_v1 }
 0x10f   :  { %3658 = vmatpush3.bf16.msra.mxu0 %v4055_v3  ;;  %v4253_v3 = vpop.permute.xlu1 %1182 }
 0x110   :  { %3659 = vmatprep.subr.bf16.mxu0 %v3903_v1  ;;  %vm1710_vm3 = vcmp.eq.s32.totalorder %v4137_v12, %v4253_v3 }
 0x113   :  { %3661 = vmatpush3.bf16.msra.mxu0 %v4057_v4  ;;  %v4255_v4 = vpop.permute.xlu0 %1178  ;;  %v4258_v56 = vpop.permute.xlu1 %1186 }
 0x114   :  { %3662 = vmatprep.subr.bf16.mxu0 %v3903_v1  ;;  %vm1709_vm4 = vcmp.eq.s32.totalorder %v4137_v12, %v4255_v4  ;;  %vm1711_vm5 = vcmp.eq.s32.totalorder %v4137_v12, %v4258_v56 }
 0x116   :  { %3467 = vmatmul.mubr.msk.f32.vlgmr.msra.gmra.mrb[0].mxu0 %vm86_vm1, %v3262_v40 }
 0x117   :  { %3664 = vmatpush3.bf16.msra.mxu0 %v3983_v14  ;;  %3485 = vmatprep.mubr.msk.f32.mxu0 %vm3904_vm0, %v3905_v31  ;;  %v4216_v14 = vpack.c.bf16 %v657_v11, %v654_v10  ;;  %v4263_v7 = vpop.permute.xlu0 %1190  ;;  %v4266_v8 = vpop.permute.xlu1 %1194  ;;  %v1577_v11 = vsub.s32 6, %v4079_v39 }
 0x118   :  { %3665 = vmatprep.subr.bf16.mxu0 %v3903_v1  ;;  %vm1712_vm6 = vcmp.eq.s32.totalorder %v4137_v12, %v4263_v7  ;;  %vm1713_vm7 = vcmp.eq.s32.totalorder %v4137_v12, %v4266_v8 }
 0x119   :  { %v1578_v35 = vrot.slane %v4084_v45, %v1577_v11 }
 0x11b   :  { %3667 = vmatpush3.bf16.msra.mxu0 %v3996_v23  ;;  %v1377_v23 = vrot.slane %v4084_v45, %v1376_v22  ;;  %v4268_v10 = vpop.permute.xlu0 %1198  ;;  %v4273_v57 = vpop.permute.xlu1 %1202 }
 0x11c   :  { %3668 = vmatprep.subr.bf16.mxu0 %v3903_v1  ;;  %vm1714_vm8 = vcmp.eq.s32.totalorder %v4137_v12, %v4268_v10  ;;  %vm1715_vm9 = vcmp.eq.s32.totalorder %v4137_v12, %v4273_v57 }
 0x11d   :  { %1379 = vbcast.lane.b32.xlu1 %v1377_v23, 256  ;;  %1383 = vbcast.lane.b32.xlu0 %v1377_v23, 264 }
 0x11f   :  { %3670 = vmatpush3.bf16.msra.mxu0 %v4014_v34  ;;  %v3699_v34 = vpack.c.bf16 %v4061_v17, %v4059_v13  ;;  %v4275_v58 = vpop.permute.xlu0 %1206  ;;  %v4280_v36 = vpop.permute.xlu1 %1210  ;;  %v3726_v17 = vpack.c.bf16 %v742_v33, %v735_v32 }
 0x120   :  { %3671 = vmatprep.subr.bf16.mxu0 %v3903_v1  ;;  %vm1716_vm10 = vcmp.eq.s32.totalorder %v4137_v12, %v4275_v58  ;;  %vm1717_vm11 = vcmp.eq.s32.totalorder %v4137_v12, %v4280_v36 }
 0x121   :  { %1387 = vbcast.lane.b32.xlu1 %v1377_v23, 272  ;;  %1391 = vbcast.lane.b32.xlu0 %v1377_v23, 280 }
 0x123   :  { %3673 = vmatpush3.bf16.msra.mxu0 %v4021_v41  ;;  %v4284_v43 = vpop.permute.xlu1 %1218 }
 0x124   :  { %3674 = vmatprep.subr.bf16.mxu0 %v3903_v1  ;;  %vm1719_vm13 = vcmp.eq.s32.totalorder %v4137_v12, %v4284_v43 }
 0x125   :  { %1395 = vbcast.lane.b32.xlu1 %v1377_v23, 288  ;;  %1399 = vbcast.lane.b32.xlu0 %v1377_v23, 296 }
 0x126   :  { %3486 = vmatmul.mubr.msk.f32.vlgmr.msra.gmra.mrb[0].mxu0 %vm86_vm1, %v3262_v40  ;;  %v4282_v40 = vpop.permute.xlu0 %1214 }
 0x127   :  { %3504 = vmatprep.mubr.msk.f32.mxu0 %vm3904_vm0, %v3905_v31  ;;  %v4294_v50 = vpop.permute.xlu1 %1226  ;;  %vm1718_vm12 = vcmp.eq.s32.totalorder %v4137_v12, %v4282_v40 }
 0x128   :  { %vm1721_vm15 = vcmp.eq.s32.totalorder %v4137_v12, %v4294_v50 }
 0x129   :  { %1403 = vbcast.lane.b32.xlu1 %v1377_v23, 304  ;;  %1407 = vbcast.lane.b32.xlu0 %v1377_v23, 312 }
 0x12a   :  { %v4287_v49 = vpop.permute.xlu0 %1222 }
 0x12b   :  { %v4303_v13 = vpop.permute.xlu1 %1234  ;;  %vm1720_vm14 = vcmp.eq.s32.totalorder %v4137_v12, %v4287_v49 }
 0x12c   :  { %3676 = vmatpush3.bf16.xpose.msra.mxu0 %v4065_v19  ;;  %vm1723_vm2 = vcmp.eq.s32.totalorder %v4137_v12, %v4303_v13 }
 0x12d   :  { %3677 = vmatprep.subr.bf16.mxu0 %v3903_v1  ;;  %1411 = vbcast.lane.b32.xlu1 %v1377_v23, 320 }
 0x12e   :  { %1415 = vbcast.lane.b32.xlu0 %v1377_v23, 328  ;;  %v4296_v55 = vpop.permute.xlu0 %1230 }
 0x12f   :  { %v4312_v28 = vpop.permute.xlu1 %1245 }
 0x131   :  { %1419 = vbcast.lane.b32.xlu1 %v1377_v23, 336 }
 0x132   :  { %1423 = vbcast.lane.b32.xlu0 %v1377_v23, 344  ;;  %v4309_v27 = vpop.permute.xlu0 %1238 }
 0x133   :  { %v4322_v32 = vpop.permute.xlu1 %1253 }
 0x134   :  { %3679 = vmatpush3.bf16.xpose.msra.mxu0 %v4086_v46 }
 0x135   :  { %3680 = vmatprep.subr.bf16.mxu0 %v3903_v1  ;;  %1427 = vbcast.lane.b32.xlu1 %v1377_v23, 352 }
 0x136   :  { %1431 = vbcast.lane.b32.xlu0 %v1377_v23, 360  ;;  %v4315_v16 = vpop.permute.xlu0 %1249 }
 0x137   :  { %v4331_v53 = vpop.permute.xlu1 %1261 }
 0x139   :  { %1435 = vbcast.lane.b32.xlu1 %v1377_v23, 368 }
 0x13a   :  { %1439 = vbcast.lane.b32.xlu0 %v1377_v23, 376  ;;  %v4324_v33 = vpop.permute.xlu0 %1257 }
 0x13b   :  { %v4336_v45 = vpop.permute.xlu1 %1269 }
 0x13c   :  { %3682 = vmatpush3.bf16.xpose.msra.mxu0 %v4107_v9 }
 0x13d   :  { %3683 = vmatprep.subr.bf16.mxu0 %v3903_v1  ;;  %1446 = vbcast.lane.b32.xlu1 %v1444_v29, 256 }
 0x13e   :  { %1450 = vbcast.lane.b32.xlu0 %v1444_v29, 264  ;;  %v4333_v5 = vpop.permute.xlu0 %1265 }
 0x13f   :  { %v4345_v37 = vpop.permute.xlu1 %1277 }
 0x141   :  { %1454 = vbcast.lane.b32.xlu1 %v1444_v29, 272 }
 0x142   :  { %1458 = vbcast.lane.b32.xlu0 %v1444_v29, 280  ;;  %v4338_v6 = vpop.permute.xlu0 %1273 }
 0x143   :  { %v4349_v44 = vpop.permute.xlu1 %1285 }
 0x144   :  { %3685 = vmatpush3.bf16.xpose.msra.mxu0 %v4216_v14 }
 0x145   :  { %1462 = vbcast.lane.b32.xlu1 %v1444_v29, 288 }
 0x146   :  { %1466 = vbcast.lane.b32.xlu0 %v1444_v29, 296  ;;  %v4347_v38 = vpop.permute.xlu0 %1281 }
 0x149   :  { %1470 = vbcast.lane.b32.xlu1 %v1444_v29, 304 }
 0x14a   :  { %1474 = vbcast.lane.b32.xlu0 %v1444_v29, 312  ;;  %v4352_v48 = vpop.permute.xlu0 %1289 }
 0x14d   :  { %1478 = vbcast.lane.b32.xlu1 %v1444_v29, 320 }
 0x14e   :  { %1482 = vbcast.lane.b32.xlu0 %v1444_v29, 328 }
 0x151   :  { %1486 = vbcast.lane.b32.xlu1 %v1444_v29, 336 }
 0x152   :  { %1490 = vbcast.lane.b32.xlu0 %v1444_v29, 344 }
 0x155   :  { %1494 = vbcast.lane.b32.xlu1 %v1444_v29, 352 }
 0x156   :  { %1498 = vbcast.lane.b32.xlu0 %v1444_v29, 360 }
 0x159   :  { %1502 = vbcast.lane.b32.xlu1 %v1444_v29, 368 }
 0x15a   :  { %1506 = vbcast.lane.b32.xlu0 %v1444_v29, 376 }
 0x15d   :  { %1513 = vbcast.lane.b32.xlu1 %v1511_v0, 256 }
 0x15e   :  { %1517 = vbcast.lane.b32.xlu0 %v1511_v0, 264 }
 0x161   :  { %1521 = vbcast.lane.b32.xlu1 %v1511_v0, 272 }
 0x162   :  { %1525 = vbcast.lane.b32.xlu0 %v1511_v0, 280 }
 0x165   :  { %1529 = vbcast.lane.b32.xlu1 %v1511_v0, 288 }
 0x166   :  { %1533 = vbcast.lane.b32.xlu0 %v1511_v0, 296 }
 0x169   :  { %1537 = vbcast.lane.b32.xlu1 %v1511_v0, 304 }
 0x16a   :  { %1541 = vbcast.lane.b32.xlu0 %v1511_v0, 312 }
 0x16d   :  { %1545 = vbcast.lane.b32.xlu1 %v1511_v0, 320 }
 0x16e   :  { %1549 = vbcast.lane.b32.xlu0 %v1511_v0, 328 }
 0x171   :  { %1553 = vbcast.lane.b32.xlu1 %v1511_v0, 336 }
 0x172   :  { %1557 = vbcast.lane.b32.xlu0 %v1511_v0, 344 }
 0x175   :  { %1561 = vbcast.lane.b32.xlu1 %v1511_v0, 352 }
 0x176   :  { %1565 = vbcast.lane.b32.xlu0 %v1511_v0, 360 }
 0x179   :  { %1569 = vbcast.lane.b32.xlu1 %v1511_v0, 368 }
 0x17a   :  { %1573 = vbcast.lane.b32.xlu0 %v1511_v0, 376 }
 0x17d   :  { %1580 = vbcast.lane.b32.xlu1 %v1578_v35, 256 }
 0x17e   :  { %1584 = vbcast.lane.b32.xlu0 %v1578_v35, 264 }
 0x181   :  { %1588 = vbcast.lane.b32.xlu1 %v1578_v35, 272 }
 0x182   :  { %1592 = vbcast.lane.b32.xlu0 %v1578_v35, 280 }
 0x185   :  { %1596 = vbcast.lane.b32.xlu1 %v1578_v35, 288 }
 0x186   :  { %1600 = vbcast.lane.b32.xlu0 %v1578_v35, 296 }
 0x189   :  { %1604 = vbcast.lane.b32.xlu1 %v1578_v35, 304 }
 0x18a   :  { %1608 = vbcast.lane.b32.xlu0 %v1578_v35, 312 }
 0x18d   :  { %1612 = vbcast.lane.b32.xlu1 %v1578_v35, 320 }
 0x18e   :  { %1616 = vbcast.lane.b32.xlu0 %v1578_v35, 328 }
 0x191   :  { %1620 = vbcast.lane.b32.xlu1 %v1578_v35, 336 }
 0x192   :  { %1624 = vbcast.lane.b32.xlu0 %v1578_v35, 344 }
 0x195   :  { %1628 = vbcast.lane.b32.xlu1 %v1578_v35, 352 }
 0x196   :  { %1632 = vbcast.lane.b32.xlu0 %v1578_v35, 360 }
 0x199   :  { %1636 = vbcast.lane.b32.xlu1 %v1578_v35, 368 }
 0x19a   :  { %1640 = vbcast.lane.b32.xlu0 %v1578_v35, 376 }
 0x19d   :  { %1647 = vbcast.lane.b32.xlu1 %v1645_v25, 256 }
 0x19e   :  { %1651 = vbcast.lane.b32.xlu0 %v1645_v25, 264 }
 0x1a1   :  { %1655 = vbcast.lane.b32.xlu1 %v1645_v25, 272 }
 0x1a2   :  { %1659 = vbcast.lane.b32.xlu0 %v1645_v25, 280 }
 0x1a5   :  { %1663 = vbcast.lane.b32.xlu1 %v1645_v25, 288 }
 0x1a6   :  { %1667 = vbcast.lane.b32.xlu0 %v1645_v25, 296 }
 0x1a9   :  { %1671 = vbcast.lane.b32.xlu1 %v1645_v25, 304 }
 0x1aa   :  { %1675 = vbcast.lane.b32.xlu0 %v1645_v25, 312 }
 0x1ad   :  { %1679 = vbcast.lane.b32.xlu1 %v1645_v25, 320 }
 0x1ae   :  { %1683 = vbcast.lane.b32.xlu0 %v1645_v25, 328 }
 0x1b1   :  { %1687 = vbcast.lane.b32.xlu1 %v1645_v25, 336 }
 0x1b2   :  { %1691 = vbcast.lane.b32.xlu0 %v1645_v25, 344 }
 0x1b5   :  { %1695 = vbcast.lane.b32.xlu1 %v1645_v25, 352 }
 0x1b6   :  { %1699 = vbcast.lane.b32.xlu0 %v1645_v25, 360 }
 0x1f9   :  { %v623_v30 = vpop.f32.mrb[0].mxu0 }
 0x1fa   :  { %v4229_v41 = vand.u32 4294901760, %v623_v30  ;;  %v3487_v42 = vpop.f32.mrb[1].mxu0 }
 0x1fc   :  { %v4232_v47 = vsub.f32 %v623_v30, %v4229_v41  ;;  %3524 = vmatmul.mubr.f32.vlgmr.msra.gmra.mrb[0].mxu1 %v4229_v41 }
 0x1fd   :  { %3700 = vmatpush3.bf16.xpose.msra.mxu1 %v3699_v34  ;;  %3542 = vmatprep.mubr.msk.f32.mxu1 %vm3904_vm0, %v3905_v31 }
 0x1fe   :  { %v710_v54 = vand.u32 4294901760, %v4232_v47  ;;  %3701 = vmatprep.subr.bf16.mxu1 %v3903_v1 }
 0x200   :  { %v711_v59 = vsub.f32 %v4232_v47, %v710_v54 }
 0x202   :  { %v712_v61 = vand.u32 4294901760, %v711_v59 }
 0x204   :  { %3505 = vmatmul.mubr.f32.vlgmr.msra.gmra.mrb[2].mxu0 %v712_v61 }
 0x205   :  { %3703 = vmatpush3.bf16.xpose.msra.mxu1 %v3702_v60 }
 0x206   :  { %3704 = vmatprep.subr.bf16.mxu1 %v3903_v1 }
 0x20d   :  { %3706 = vmatpush3.bf16.xpose.msra.mxu1 %v3705_v63 }
 0x20e   :  { %3707 = vmatprep.subr.bf16.mxu1 %v3903_v1 }
 0x215   :  { %3709 = vmatpush3.bf16.xpose.msra.mxu1 %v3708_v2 }
 0x216   :  { %3710 = vmatprep.subr.bf16.mxu1 %v3903_v1 }
 0x21c   :  { %3543 = vmatmul.mubr.f32.vlgmr.msra.gmra.mrb[0].mxu1 %v4232_v47 }
 0x21d   :  { %3712 = vmatpush3.bf16.xpose.msra.mxu1 %v4065_v19  ;;  %3561 = vmatprep.mubr.msk.f32.mxu1 %vm3904_vm0, %v3905_v31 }
 0x21e   :  { %3713 = vmatprep.subr.bf16.mxu1 %v3903_v1 }
 0x225   :  { %3715 = vmatpush3.bf16.xpose.msra.mxu1 %v4086_v46 }
 0x226   :  { %3716 = vmatprep.subr.bf16.mxu1 %v3903_v1 }
 0x22d   :  { %3718 = vmatpush3.bf16.xpose.msra.mxu1 %v4107_v9 }
 0x22e   :  { %3719 = vmatprep.subr.bf16.mxu1 %v3903_v1 }
 0x235   :  { %3721 = vmatpush3.bf16.xpose.msra.mxu1 %v4216_v14 }
 0x236   :  { %3722 = vmatprep.subr.bf16.mxu1 %v3903_v1 }
 0x23c   :  { %3562 = vmatmul.mubr.f32.vlgmr.msra.gmra.mrb[0].mxu1 %v710_v54 }
 0x23d   :  { %3724 = vmatpush3.bf16.xpose.msra.mxu1 %v3723_v26  ;;  %3580 = vmatprep.mubr.msk.f32.mxu1 %vm3904_vm0, %v3905_v31 }
 0x23e   :  { %3725 = vmatprep.subr.bf16.mxu1 %v3903_v1 }
 0x245   :  { %3727 = vmatpush3.bf16.xpose.msra.mxu1 %v3726_v17 }
 0x246   :  { %3728 = vmatprep.subr.bf16.mxu1 %v3903_v1 }
 0x24d   :  { %3730 = vmatpush3.bf16.xpose.msra.mxu1 %v3729_v18 }
 0x24e   :  { %3731 = vmatprep.subr.bf16.mxu1 %v3903_v1 }
 0x255   :  { %3733 = vmatpush3.bf16.xpose.msra.mxu1 %v3732_v52 }
 0x256   :  { %3734 = vmatprep.subr.bf16.mxu1 %v3903_v1 }
 0x25c   :  { %3581 = vmatmul.mubr.f32.vlgmr.msra.gmra.mrb[0].mxu1 %v4229_v41 }
 0x25d   :  { %3736 = vmatpush3.bf16.xpose.msra.mxu1 %v4065_v19  ;;  %3599 = vmatprep.mubr.msk.f32.mxu1 %vm3904_vm0, %v3905_v31  ;;  %v4355_v31 = vpop.permute.xlu1 %1293  ;;  %v4357_v19 = vpop.permute.xlu0 %1297  ;;  %vm1722_vm0 = vcmp.eq.s32.totalorder %v4137_v12, %v4296_v55 }
 0x25e   :  { %3737 = vmatprep.subr.bf16.mxu1 %v3903_v1  ;;  %1703 = vbcast.lane.b32.xlu1 %v1645_v25, 368 }
 0x25f   :  { %1707 = vbcast.lane.b32.xlu0 %v1645_v25, 376 }
 0x261   :  { %v4365_v20 = vpop.permute.xlu0 %1305 }
 0x265   :  { %3739 = vmatpush3.bf16.xpose.msra.mxu1 %v4086_v46  ;;  %v4363_v46 = vpop.permute.xlu1 %1301  ;;  %v4369_v22 = vpop.permute.xlu0 %1316 }
 0x266   :  { %3740 = vmatprep.subr.bf16.mxu1 %v3903_v1 }
 0x269   :  { %v4367_v21 = vpop.permute.xlu1 %1312  ;;  %v4373_v24 = vpop.permute.xlu0 %1324 }
 0x26d   :  { %3742 = vmatpush3.bf16.xpose.msra.mxu1 %v4107_v9  ;;  %v4371_v23 = vpop.permute.xlu1 %1320  ;;  %v4377_v9 = vpop.permute.xlu0 %1332 }
 0x26e   :  { %3743 = vmatprep.subr.bf16.mxu1 %v3903_v1 }
 0x271   :  { %v4375_v29 = vpop.permute.xlu1 %1328  ;;  %v4381_v34 = vpop.permute.xlu0 %1340 }
 0x275   :  { %3745 = vmatpush3.bf16.xpose.msra.mxu1 %v4216_v14  ;;  %v4379_v30 = vpop.permute.xlu1 %1336  ;;  %v4385_v42 = vpop.permute.xlu0 %1348 }
 0x279   :  { %v4389_v54 = vpop.permute.xlu0 %1356 }
 0x27c   :  { %3600 = vmatmul.mubr.f32.vlgmr.msra.gmra.mrb[0].mxu1 %v4229_v41  ;;  %v4383_v41 = vpop.permute.xlu1 %1344 }
 0x27d   :  { %v4393_v60 = vpop.permute.xlu0 %1364 }
 0x280   :  { %v4387_v47 = vpop.permute.xlu1 %1352 }
 0x281   :  { %v4397_v62 = vpop.permute.xlu0 %1372 }
 0x282   :  { %5519 = vst [vmem:[#allocation16_spill] sm:$0xff] %v4397_v62 }
 0x284   :  { %v4391_v59 = vpop.permute.xlu1 %1360 }
 0x285   :  { %v4401_v0 = vpop.permute.xlu0 %1383 }
 0x286   :  { %5521 = vst [vmem:[#allocation18_spill] sm:$0xff] %v4401_v0 }
 0x288   :  { %v4395_v61 = vpop.permute.xlu1 %1368 }
 0x289   :  { %v4405_v11 = vpop.permute.xlu0 %1391 }
 0x28a   :  { %5523 = vst [vmem:[#allocation20_spill] sm:$0xff] %v4405_v11 }
 0x28c   :  { %v4399_v63 = vpop.permute.xlu1 %1379 }
 0x28d   :  { %5520 = vst [vmem:[#allocation17_spill] sm:$0xff] %v4399_v63  ;;  %v4409_v26 = vpop.permute.xlu0 %1399 }
 0x28e   :  { %5525 = vst [vmem:[#allocation22_spill] sm:$0xff] %v4409_v26 }
 0x290   :  { %v4403_v2 = vpop.permute.xlu1 %1387 }
 0x291   :  { %5522 = vst [vmem:[#allocation19_spill] sm:$0xff] %v4403_v2  ;;  %v4413_v15 = vpop.permute.xlu0 %1407 }
 0x292   :  { %5527 = vst [vmem:[#allocation24_spill] sm:$0xff] %v4413_v15 }
 0x294   :  { %v4407_v35 = vpop.permute.xlu1 %1395 }
 0x295   :  { %5524 = vst [vmem:[#allocation21_spill] sm:$0xff] %v4407_v35  ;;  %v4417_v25 = vpop.permute.xlu0 %1415 }
 0x296   :  { %5529 = vst [vmem:[#allocation26_spill] sm:$0xff] %v4417_v25 }
 0x298   :  { %v4411_v17 = vpop.permute.xlu1 %1403 }
 0x299   :  { %5526 = vst [vmem:[#allocation23_spill] sm:$0xff] %v4411_v17 }
 0x29c   :  { %v4415_v18 = vpop.permute.xlu1 %1411 }
 0x29d   :  { %5528 = vst [vmem:[#allocation25_spill] sm:$0xff] %v4415_v18 }
 0x2a0   :  { %v4419_v52 = vpop.permute.xlu1 %1419 }
 0x2a1   :  { %5530 = vst [vmem:[#allocation27_spill] sm:$0xff] %v4419_v52 }
 0x2a4   :  { %v4423_v0 = vpop.permute.xlu1 %1427 }
 0x2a5   :  { %5532 = vst [vmem:[#allocation29_spill] sm:$0xff] %v4423_v0 }
 0x2a8   :  { %v4427_v11 = vpop.permute.xlu1 %1435 }
 0x2a9   :  { %5534 = vst [vmem:[#allocation31_spill] sm:$0xff] %v4427_v11 }
 0x2ac   :  { %v4431_v26 = vpop.permute.xlu1 %1446 }
 0x2ad   :  { %5536 = vst [vmem:[#allocation33_spill] sm:$0xff] %v4431_v26 }
 0x2b0   :  { %v4435_v15 = vpop.permute.xlu1 %1454 }
 0x2b1   :  { %5538 = vst [vmem:[#allocation35_spill] sm:$0xff] %v4435_v15 }
 0x2b4   :  { %v4439_v25 = vpop.permute.xlu1 %1462 }
 0x2b5   :  { %5540 = vst [vmem:[#allocation37_spill] sm:$0xff] %v4439_v25 }
 0x2d7   :  { %v714_v1 = vpop.f32.mrb[2].mxu0 }
 0x2d8   :  { %v3506_v14 = vpop.f32.mrb[3].mxu0 }
 0x2d9   :  { %v4421_v14 = vpop.permute.xlu0 %1423 }
 0x2da   :  { %5531 = vst [vmem:[#allocation28_spill] sm:$0xff] %v4421_v14  ;;  %v4443_v14 = vpop.permute.xlu1 %1470 }
 0x2db   :  { %5542 = vst [vmem:[#allocation39_spill] sm:$0xff] %v4443_v14 }
 0x2dd   :  { %v4425_v2 = vpop.permute.xlu0 %1431 }
 0x2de   :  { %5533 = vst [vmem:[#allocation30_spill] sm:$0xff] %v4425_v2  ;;  %v4447_v2 = vpop.permute.xlu1 %1478 }
 0x2df   :  { %5544 = vst [vmem:[#allocation41_spill] sm:$0xff] %v4447_v2 }
 0x2e1   :  { %v4429_v35 = vpop.permute.xlu0 %1439 }
 0x2e2   :  { %5535 = vst [vmem:[#allocation32_spill] sm:$0xff] %v4429_v35  ;;  %v3906_v35 = vmov 1966171168   ;;  %v4451_v26 = vpop.permute.xlu1 %1486 }
 0x2e3   :  { %v1840_v63 = vunpack.c.l.s4 %v3906_v35 }
 0x2e5   :  { %v4433_v17 = vpop.permute.xlu0 %1450  ;;  %v1841_v15 = vunpack.c.0.s8 %v1840_v63 }
 0x2e6   :  { %5537 = vst [vmem:[#allocation34_spill] sm:$0xff] %v4433_v17 }
 0x2e7   :  { %v4458_v25 = vsub.s32 %v1841_v15, %v4079_v39 }
 0x2e9   :  { %v4437_v18 = vpop.permute.xlu0 %1458 }
 0x2ea   :  { %5539 = vst [vmem:[#allocation36_spill] sm:$0xff] %v4437_v18  ;;  %v4455_v18 = vpop.permute.xlu1 %1494 }
 0x2eb   :  { %5547 = vst [vmem:[#allocation44_spill] sm:$0xff] %v4455_v18 }
 0x2ed   :  { %v4441_v52 = vpop.permute.xlu0 %1466 }
 0x2ee   :  { %5541 = vst [vmem:[#allocation38_spill] sm:$0xff] %v4441_v52  ;;  %v4470_v63 = vpop.permute.xlu1 %1502 }
 0x2f1   :  { %v4445_v0 = vpop.permute.xlu0 %1474 }
 0x2f2   :  { %5543 = vst [vmem:[#allocation40_spill] sm:$0xff] %v4445_v0 }
 0x2f5   :  { %v4449_v11 = vpop.permute.xlu0 %1482 }
 0x2f6   :  { %5545 = vst [vmem:[#allocation42_spill] sm:$0xff] %v4449_v11 }
 0x2f9   :  { %v4453_v17 = vpop.permute.xlu0 %1490 }
 0x2fa   :  { %5546 = vst [vmem:[#allocation43_spill] sm:$0xff] %v4453_v17 }
 0x2fd   :  { %v4460_v52 = vpop.permute.xlu0 %1498 }
 0x301   :  { %v4472_v18 = vpop.permute.xlu0 %1506 }
 0x34f   :  { %v1168_v14 = vpop.f32.mrb[0].mxu1 }
 0x350   :  { %v3746_v0 = vadd.f32 %v1168_v14, %v714_v1  ;;  %v3601_v62 = vpop.f32.mrb[1].mxu1  ;;  %v4494_v14 = vpop.permute.xlu1 %1513 }
 0x352   :  { %v1838_v2 = vcombine.high %v3746_v0, %v3746_v0  ;;  %v4463_v11 = vrot.slane %v3746_v0, %v4458_v25 }
 0x354   :  { %v1852_v35 = vrot.slane %v1838_v2, %v4458_v25  ;;  %v4468_v17 = vrot.slane %v4463_v11, %v4458_v25 }
 0x356   :  { %v1854_v15 = vcombine.high %v1852_v35, %v1852_v35  ;;  %v4475_v39 = vrot.slane %v1852_v35, %v4458_v25  ;;  %v4479_v1 = vrot.slane %v4468_v17, %v4092_v51  ;;  %v4496_v35 = vpop.permute.xlu0 %1517 }
 0x358   :  { %v4486_v62 = vrot.slane %v1854_v15, %v4458_v25  ;;  %v1927_v0 = vsel %vm1709_vm4, %v4479_v1, 0.0  ;;  %v1928_v2 = vsel %vm1710_vm3, %v4479_v1, 0.0  ;;  %v1930_v15 = vsel %vm1712_vm6, %v4479_v1, 0.0 }
 0x359   :  { %v2055_v3 = vsel %vm86_vm1, %v1927_v0, 0.0  ;;  %v2058_v4 = vsel %vm86_vm1, %v1928_v2, 0.0  ;;  %v2064_v56 = vsel %vm86_vm1, %v1930_v15, 0.0  ;;  %v1932_v0 = vsel %vm1714_vm8, %v4479_v1, 0.0 }
 0x35a   :  { %5548 = vst [vmem:[#allocation45_spill] sm:$0xff] %v4486_v62  ;;  %2056 = vadd.xlane.f32.xlu1 %v2055_v3  ;;  %2059 = vadd.xlane.f32.xlu0 %v2058_v4  ;;  %v1929_v62 = vsel %vm1711_vm5, %v4479_v1, 0.0  ;;  %v1931_v2 = vsel %vm1713_vm7, %v4479_v1, 0.0  ;;  %v4510_v3 = vpop.permute.xlu1 %1521  ;;  %v4512_v4 = vpop.permute.xlu0 %1525  ;;  %v2070_v8 = vsel %vm86_vm1, %v1932_v0, 0.0  ;;  %v1933_v15 = vsel %vm1715_vm9, %v4479_v1, 0.0 }
 0x35b   :  { %v2061_v7 = vsel %vm86_vm1, %v1929_v62, 0.0  ;;  %v2067_v10 = vsel %vm86_vm1, %v1931_v2, 0.0  ;;  %v1934_v62 = vsel %vm1716_vm10, %v4479_v1, 0.0  ;;  %v1936_v0 = vsel %vm1718_vm12, %v4479_v1, 0.0 }
 0x35c   :  { %v2076_v58 = vsel %vm86_vm1, %v1934_v62, 0.0  ;;  %v1935_v2 = vsel %vm1717_vm11, %v4479_v1, 0.0  ;;  %v2082_v36 = vsel %vm86_vm1, %v1936_v0, 0.0  ;;  %v1937_v62 = vsel %vm1719_vm13, %v4479_v1, 0.0 }
 0x35d   :  { %v2079_v40 = vsel %vm86_vm1, %v1935_v2, 0.0  ;;  %v2085_v49 = vsel %vm86_vm1, %v1937_v62, 0.0  ;;  %v1939_v0 = vsel %vm1721_vm15, %v4479_v1, 0.0  ;;  %vm1724_vm3 = vcmp.eq.s32.totalorder %v4137_v12, %v4309_v27 }
 0x35e   :  { %2065 = vadd.xlane.f32.xlu1 %v2064_v56  ;;  %2062 = vadd.xlane.f32.xlu0 %v2061_v7  ;;  %v4526_v57 = vpop.permute.xlu1 %1529  ;;  %v4528_v56 = vpop.permute.xlu0 %1533  ;;  %v2073_v7 = vsel %vm86_vm1, %v1933_v15, 0.0  ;;  %v1941_v13 = vsel %vm1723_vm2, %v4479_v1, 0.0  ;;  %vm1725_vm4 = vcmp.eq.s32.totalorder %v4137_v12, %v4312_v28  ;;  %vm1726_vm5 = vcmp.eq.s32.totalorder %v4137_v12, %v4315_v16 }
 0x35f   :  { %vm1727_vm6 = vcmp.eq.s32.totalorder %v4137_v12, %v4322_v32  ;;  %vm1728_vm7 = vcmp.eq.s32.totalorder %v4137_v12, %v4324_v33  ;;  %vm1729_vm8 = vcmp.eq.s32.totalorder %v4137_v12, %v4331_v53  ;;  %vm1730_vm9 = vcmp.eq.s32.totalorder %v4137_v12, %v4333_v5 }
 0x360   :  { %vm1731_vm10 = vcmp.eq.s32.totalorder %v4137_v12, %v4336_v45  ;;  %vm1732_vm11 = vcmp.eq.s32.totalorder %v4137_v12, %v4338_v6  ;;  %vm1733_vm12 = vcmp.eq.s32.totalorder %v4137_v12, %v4345_v37  ;;  %vm1734_vm13 = vcmp.eq.s32.totalorder %v4137_v12, %v4347_v38 }
 0x361   :  { %vm1736_vm15 = vcmp.eq.s32.totalorder %v4137_v12, %v4352_v48  ;;  %vm1738_vm2 = vcmp.eq.s32.totalorder %v4137_v12, %v4357_v19 }
 0x362   :  { %2071 = vadd.xlane.f32.xlu1 %v2070_v8  ;;  %2068 = vadd.xlane.f32.xlu0 %v2067_v10  ;;  %v1853_v8 = vcombine.high %v4463_v11, %v4463_v11  ;;  %v1938_v10 = vsel %vm1720_vm14, %v4479_v1, 0.0  ;;  %v4544_v15 = vpop.permute.xlu1 %1537  ;;  %vm1735_vm14 = vcmp.eq.s32.totalorder %v4137_v12, %v4349_v44 }
 0x363   :  { %v2088_v43 = vsel %vm86_vm1, %v1938_v10, 0.0 }
 0x364   :  { %v4555_v11 = vrot.slane %v1853_v8, %v4458_v25  ;;  %v2091_v25 = vsel %vm86_vm1, %v1939_v0, 0.0  ;;  %v2097_v8 = vsel %vm86_vm1, %v1941_v13, 0.0 }
 0x366   :  { %2077 = vadd.xlane.f32.xlu1 %v2076_v58  ;;  %2074 = vadd.xlane.f32.xlu0 %v2073_v7  ;;  %v4546_v58 = vpop.permute.xlu0 %1541  ;;  %v1940_v7 = vsel %vm1722_vm0, %v4479_v1, 0.0  ;;  %v4563_v50 = vpop.permute.xlu1 %1545  ;;  %vm1737_vm0 = vcmp.eq.s32.totalorder %v4137_v12, %v4355_v31 }
 0x367   :  { %v2094_v2 = vsel %vm86_vm1, %v1940_v7, 0.0 }
 0x36a   :  { %2083 = vadd.xlane.f32.xlu1 %v2082_v36  ;;  %2080 = vadd.xlane.f32.xlu0 %v2079_v40  ;;  %v4565_v55 = vpop.permute.xlu0 %1549  ;;  %v4571_v36 = vrot.slane %v4555_v11, %v4092_v51  ;;  %v1942_v40 = vsel %vm1724_vm3, %v4479_v1, 0.0  ;;  %vm1739_vm3 = vcmp.eq.s32.totalorder %v4137_v12, %v4363_v46 }
 0x36b   :  { %v2100_v27 = vsel %vm86_vm1, %v1942_v40, 0.0 }
 0x36c   :  { %v1944_v10 = vsel %vm1726_vm5, %v4571_v36, 0.0  ;;  %v1943_v62 = vsel %vm1725_vm4, %v4571_v36, 0.0  ;;  %v1946_v1 = vsel %vm1728_vm7, %v4571_v36, 0.0  ;;  %v1945_v7 = vsel %vm1727_vm6, %v4571_v36, 0.0 }
 0x36d   :  { %v2106_v28 = vsel %vm86_vm1, %v1944_v10, 0.0  ;;  %v2103_v16 = vsel %vm86_vm1, %v1943_v62, 0.0  ;;  %v2112_v33 = vsel %vm86_vm1, %v1946_v1, 0.0  ;;  %v1947_v40 = vsel %vm1729_vm8, %v4571_v36, 0.0 }
 0x36e   :  { %2089 = vadd.xlane.f32.xlu1 %v2088_v43  ;;  %2086 = vadd.xlane.f32.xlu0 %v2085_v49  ;;  %v4583_v43 = vpop.permute.xlu1 %1553  ;;  %v4585_v49 = vpop.permute.xlu0 %1557  ;;  %v2115_v5 = vsel %vm86_vm1, %v1947_v40, 0.0  ;;  %v1950_v13 = vsel %vm1732_vm11, %v4571_v36, 0.0  ;;  %v1952_v62 = vsel %vm1734_vm13, %v4571_v36, 0.0  ;;  %v1955_v40 = vsel %vm1737_vm0, %v4571_v36, 0.0 }
 0x36f   :  { %v2124_v45 = vsel %vm86_vm1, %v1950_v13, 0.0  ;;  %v2130_v38 = vsel %vm86_vm1, %v1952_v62, 0.0  ;;  %vm1740_vm4 = vcmp.eq.s32.totalorder %v4137_v12, %v4365_v20  ;;  %v2139_v19 = vsel %vm86_vm1, %v1955_v40, 0.0 }
 0x370   :  { %v1958_v13 = vsel %vm1740_vm4, %v4571_v36, 0.0  ;;  %vm1741_vm5 = vcmp.eq.s32.totalorder %v4137_v12, %v4367_v21  ;;  %vm1742_vm6 = vcmp.eq.s32.totalorder %v4137_v12, %v4369_v22  ;;  %vm1743_vm7 = vcmp.eq.s32.totalorder %v4137_v12, %v4371_v23 }
 0x371   :  { %vm1744_vm8 = vcmp.eq.s32.totalorder %v4137_v12, %v4373_v24  ;;  %vm1747_vm11 = vcmp.eq.s32.totalorder %v4137_v12, %v4379_v30  ;;  %vm1749_vm13 = vcmp.eq.s32.totalorder %v4137_v12, %v4383_v41  ;;  %vm1752_vm0 = vcmp.eq.s32.totalorder %v4137_v12, %v4389_v54 }
 0x372   :  { %2095 = vadd.xlane.f32.xlu1 %v2094_v2  ;;  %2092 = vadd.xlane.f32.xlu0 %v2091_v25  ;;  %v4599_v32 = vpop.permute.xlu1 %1561  ;;  %v4601_v0 = vpop.permute.xlu0 %1565  ;;  %v2109_v2 = vsel %vm86_vm1, %v1945_v7, 0.0  ;;  %v1948_v25 = vsel %vm1730_vm9, %v4571_v36, 0.0  ;;  %v1954_v7 = vsel %vm1736_vm15, %v4571_v36, 0.0  ;;  %vm1745_vm9 = vcmp.eq.s32.totalorder %v4137_v12, %v4375_v29 }
 0x373   :  { %v2118_v53 = vsel %vm86_vm1, %v1948_v25, 0.0  ;;  %v2136_v44 = vsel %vm86_vm1, %v1954_v7, 0.0  ;;  %v1956_v25 = vsel %vm1738_vm2, %v4571_v36, 0.0  ;;  %vm1751_vm15 = vcmp.eq.s32.totalorder %v4137_v12, %v4387_v47 }
 0x374   :  { %v2142_v31 = vsel %vm86_vm1, %v1956_v25, 0.0  ;;  %vm1753_vm2 = vcmp.eq.s32.totalorder %v4137_v12, %v4391_v59  ;;  %vm1755_vm4 = vcmp.eq.s32.totalorder %v4137_v12, %v4395_v61  ;;  %v5549_v59 = vld [vmem:[#allocation16_spill] sm:$0xff] }
 0x376   :  { %2101 = vadd.xlane.f32.xlu1 %v2100_v27  ;;  %2098 = vadd.xlane.f32.xlu0 %v2097_v8  ;;  %v1949_v27 = vsel %vm1731_vm10, %v4571_v36, 0.0  ;;  %v4615_v8 = vpop.permute.xlu1 %1569  ;;  %v4617_v10 = vpop.permute.xlu0 %1573  ;;  %vm1746_vm10 = vcmp.eq.s32.totalorder %v4137_v12, %v4377_v9 }
 0x377   :  { %v2121_v6 = vsel %vm86_vm1, %v1949_v27, 0.0  ;;  %v1957_v27 = vsel %vm1739_vm3, %v4571_v36, 0.0  ;;  %vm1754_vm3 = vcmp.eq.s32.totalorder %v4137_v12, %v4393_v60 }
 0x37a   :  { %2107 = vadd.xlane.f32.xlu1 %v2106_v28  ;;  %2104 = vadd.xlane.f32.xlu0 %v2103_v16  ;;  %v1951_v28 = vsel %vm1733_vm12, %v4571_v36, 0.0  ;;  %v4631_v37 = vpop.permute.xlu1 %1580  ;;  %v4633_v16 = vpop.permute.xlu0 %1584  ;;  %vm1748_vm12 = vcmp.eq.s32.totalorder %v4137_v12, %v4381_v34 }
 0x37b   :  { %v2127_v1 = vsel %vm86_vm1, %v1951_v28, 0.0 }
 0x37e   :  { %2113 = vadd.xlane.f32.xlu1 %v2112_v33  ;;  %2110 = vadd.xlane.f32.xlu0 %v2109_v2  ;;  %v1953_v33 = vsel %vm1735_vm14, %v4571_v36, 0.0  ;;  %v1883_v2 = vcombine.high %v4468_v17, %v4468_v17  ;;  %vm1750_vm14 = vcmp.eq.s32.totalorder %v4137_v12, %v4385_v42 }
 0x37f   :  { %v2133_v48 = vsel %vm86_vm1, %v1953_v33, 0.0 }
 0x380   :  { %v4660_v17 = vrot.slane %v1883_v2, %v4092_v51 }
 0x382   :  { %2119 = vadd.xlane.f32.xlu1 %v2118_v53  ;;  %2116 = vadd.xlane.f32.xlu0 %v2115_v5  ;;  %v4649_v53 = vpop.permute.xlu1 %1588  ;;  %v4651_v5 = vpop.permute.xlu0 %1592  ;;  %v1960_v62 = vsel %vm1742_vm6, %v4660_v17, 0.0  ;;  %v1959_v36 = vsel %vm1741_vm5, %v4660_v17, 0.0  ;;  %v1962_v28 = vsel %vm1744_vm8, %v4660_v17, 0.0  ;;  %v1964_v33 = vsel %vm1746_vm10, %v4660_v17, 0.0 }
 0x383   :  { %v2154_v21 = vsel %vm86_vm1, %v1960_v62, 0.0  ;;  %v2151_v22 = vsel %vm86_vm1, %v1959_v36, 0.0  ;;  %v2160_v23 = vsel %vm86_vm1, %v1962_v28, 0.0  ;;  %v2166_v9 = vsel %vm86_vm1, %v1964_v33, 0.0 }
 0x384   :  { %v1966_v25 = vsel %vm1748_vm12, %v4660_v17, 0.0  ;;  %v1965_v40 = vsel %vm1747_vm11, %v4660_v17, 0.0  ;;  %vm1756_vm5 = vcmp.eq.s32.totalorder %v4137_v12, %v5549_v59 }
 0x385   :  { %v2172_v30 = vsel %vm86_vm1, %v1966_v25, 0.0  ;;  %v2169_v34 = vsel %vm86_vm1, %v1965_v40, 0.0 }
 0x386   :  { %2125 = vadd.xlane.f32.xlu1 %v2124_v45  ;;  %2122 = vadd.xlane.f32.xlu0 %v2121_v6  ;;  %v4668_v46 = vpop.permute.xlu1 %1596  ;;  %v4670_v20 = vpop.permute.xlu0 %1600  ;;  %v2148_v45 = vsel %vm86_vm1, %v1958_v13, 0.0  ;;  %v2145_v6 = vsel %vm86_vm1, %v1957_v27, 0.0 }
 0x38a   :  { %2131 = vadd.xlane.f32.xlu1 %v2130_v38  ;;  %2128 = vadd.xlane.f32.xlu0 %v2127_v1  ;;  %v1961_v38 = vsel %vm1743_vm7, %v4660_v17, 0.0  ;;  %v4684_v1 = vpop.permute.xlu1 %1604  ;;  %v4686_v7 = vpop.permute.xlu0 %1608 }
 0x38b   :  { %v2157_v24 = vsel %vm86_vm1, %v1961_v38, 0.0  ;;  %v4748_v38 = vrot.slane %v4475_v39, %v4092_v51 }
 0x38e   :  { %2137 = vadd.xlane.f32.xlu1 %v2136_v44  ;;  %2134 = vadd.xlane.f32.xlu0 %v2133_v48  ;;  %v1963_v44 = vsel %vm1745_vm9, %v4660_v17, 0.0  ;;  %v4700_v29 = vpop.permute.xlu1 %1612  ;;  %v4702_v48 = vpop.permute.xlu0 %1616 }
 0x38f   :  { %v2163_v2 = vsel %vm86_vm1, %v1963_v44, 0.0  ;;  %v5550_v44 = vld [vmem:[#allocation33_spill] sm:$0xff] }
 0x390   :  { %vm1773_vm6 = vcmp.eq.s32.totalorder %v4137_v12, %v5550_v44  ;;  %v5560_v44 = vld [vmem:[#allocation40_spill] sm:$0xff] }
 0x392   :  { %2143 = vadd.xlane.f32.xlu1 %v2142_v31  ;;  %2140 = vadd.xlane.f32.xlu0 %v2139_v19  ;;  %v1968_v31 = vsel %vm1750_vm14, %v4660_v17, 0.0  ;;  %v1967_v19 = vsel %vm1749_vm13, %v4660_v17, 0.0  ;;  %v4716_v13 = vpop.permute.xlu1 %1620  ;;  %v4718_v27 = vpop.permute.xlu0 %1624  ;;  %vm1780_vm13 = vcmp.eq.s32.totalorder %v4137_v12, %v5560_v44 }
 0x393   :  { %v2178_v41 = vsel %vm86_vm1, %v1968_v31, 0.0  ;;  %v2175_v42 = vsel %vm86_vm1, %v1967_v19, 0.0 }
 0x396   :  { %2149 = vadd.xlane.f32.xlu1 %v2148_v45  ;;  %2146 = vadd.xlane.f32.xlu0 %v2145_v6  ;;  %v1970_v45 = vsel %vm1752_vm0, %v4660_v17, 0.0  ;;  %v1969_v6 = vsel %vm1751_vm15, %v4660_v17, 0.0  ;;  %v4732_v47 = vpop.permute.xlu1 %1628  ;;  %v4734_v62 = vpop.permute.xlu0 %1632  ;;  %vm1783_vm0 = vcmp.eq.s32.totalorder %v4137_v12, %v4451_v26 }
 0x397   :  { %v2184_v54 = vsel %vm86_vm1, %v1970_v45, 0.0  ;;  %v2181_v36 = vsel %vm86_vm1, %v1969_v6, 0.0 }
 0x39a   :  { %2155 = vadd.xlane.f32.xlu1 %v2154_v21  ;;  %2152 = vadd.xlane.f32.xlu0 %v2151_v22  ;;  %v1972_v21 = vsel %vm1754_vm3, %v4660_v17, 0.0  ;;  %v1971_v22 = vsel %vm1753_vm2, %v4660_v17, 0.0  ;;  %v4752_v33 = vpop.permute.xlu1 %1636  ;;  %v4754_v61 = vpop.permute.xlu0 %1640 }
 0x39b   :  { %v2190_v60 = vsel %vm86_vm1, %v1972_v21, 0.0  ;;  %v2187_v28 = vsel %vm86_vm1, %v1971_v22, 0.0 }
 0x39e   :  { %2161 = vadd.xlane.f32.xlu1 %v2160_v23  ;;  %2158 = vadd.xlane.f32.xlu0 %v2157_v24  ;;  %v1974_v23 = vsel %vm1756_vm5, %v4660_v17, 0.0  ;;  %v1973_v24 = vsel %vm1755_vm4, %v4660_v17, 0.0  ;;  %v1991_v17 = vsel %vm1773_vm6, %v4748_v38, 0.0  ;;  %v4768_v31 = vpop.permute.xlu1 %1647  ;;  %v4770_v19 = vpop.permute.xlu0 %1651  ;;  %vm1786_vm4 = vcmp.eq.s32.totalorder %v4137_v12, %v4460_v52 }
 0x39f   :  { %v2193_v25 = vsel %vm86_vm1, %v1973_v24, 0.0  ;;  %5554 = vst [vmem:[#allocation16_spill] sm:$0xff] %v4770_v19  ;;  %v5559_v24 = vld [vmem:[#allocation39_spill] sm:$0xff]  ;;  %vm1787_vm5 = vcmp.eq.s32.totalorder %v4137_v12, %v4470_v63  ;;  %vm1788_vm6 = vcmp.eq.s32.totalorder %v4137_v12, %v4472_v18  ;;  %v5572_v18 = vld [vmem:[#allocation18_spill] sm:$0xff] }
 0x3a0   :  { %vm1779_vm12 = vcmp.eq.s32.totalorder %v4137_v12, %v5559_v24  ;;  %v2005_v63 = vsel %vm1787_vm5, %v4748_v38, 0.0  ;;  %vm2576_vm5 = vcmask 130112  }
 0x3a2   :  { %2167 = vadd.xlane.f32.xlu1 %v2166_v9  ;;  %2164 = vadd.xlane.f32.xlu0 %v2163_v2  ;;  %v5551_v9 = vld [vmem:[#allocation34_spill] sm:$0xff]  ;;  %v2196_v2 = vsel %vm86_vm1, %v1974_v23, 0.0  ;;  %v4786_v23 = vpop.permute.xlu0 %1659 }
 0x3a3   :  { %vm1774_vm7 = vcmp.eq.s32.totalorder %v4137_v12, %v5551_v9  ;;  %5558 = vst [vmem:[#allocation34_spill] sm:$0xff] %v4786_v23 }
 0x3a4   :  { %v1992_v40 = vsel %vm1774_vm7, %v4748_v38, 0.0 }
 0x3a6   :  { %2173 = vadd.xlane.f32.xlu1 %v2172_v30  ;;  %2170 = vadd.xlane.f32.xlu0 %v2169_v34  ;;  %v5552_v30 = vld [vmem:[#allocation35_spill] sm:$0xff]  ;;  %v5553_v34 = vld [vmem:[#allocation36_spill] sm:$0xff] }
 0x3a7   :  { %vm1775_vm8 = vcmp.eq.s32.totalorder %v4137_v12, %v5552_v30  ;;  %vm1776_vm9 = vcmp.eq.s32.totalorder %v4137_v12, %v5553_v34  ;;  %v5562_v30 = vld [vmem:[#allocation42_spill] sm:$0xff] }
 0x3a8   :  { %v1994_v45 = vsel %vm1776_vm9, %v4748_v38, 0.0  ;;  %v1993_v6 = vsel %vm1775_vm8, %v4748_v38, 0.0  ;;  %vm1782_vm15 = vcmp.eq.s32.totalorder %v4137_v12, %v5562_v30  ;;  %vm1758_vm8 = vcmp.eq.s32.totalorder %v4137_v12, %v5572_v18 }
 0x3a9   :  { %v2256_v21 = vsel %vm86_vm1, %v1994_v45, 0.0  ;;  %v2253_v22 = vsel %vm86_vm1, %v1993_v6, 0.0  ;;  %v2000_v6 = vsel %vm1782_vm15, %v4748_v38, 0.0 }
 0x3aa   :  { %2179 = vadd.xlane.f32.xlu1 %v2178_v41  ;;  %2176 = vadd.xlane.f32.xlu0 %v2175_v42  ;;  %v2250_v41 = vsel %vm86_vm1, %v1992_v40, 0.0  ;;  %v2247_v42 = vsel %vm86_vm1, %v1991_v17, 0.0  ;;  %v1997_v40 = vsel %vm1779_vm12, %v4748_v38, 0.0  ;;  %v5561_v17 = vld [vmem:[#allocation41_spill] sm:$0xff] }
 0x3ab   :  { %vm1781_vm14 = vcmp.eq.s32.totalorder %v4137_v12, %v5561_v17  ;;  %v2265_v45 = vsel %vm86_vm1, %v1997_v40, 0.0  ;;  %v2004_v40 = vsel %vm1786_vm4, %v4748_v38, 0.0 }
 0x3ae   :  { %2185 = vadd.xlane.f32.xlu1 %v2184_v54  ;;  %2182 = vadd.xlane.f32.xlu0 %v2181_v36  ;;  %v5555_v54 = vld [vmem:[#allocation37_spill] sm:$0xff]  ;;  %v5556_v36 = vld [vmem:[#allocation38_spill] sm:$0xff] }
 0x3af   :  { %vm1777_vm10 = vcmp.eq.s32.totalorder %v4137_v12, %v5555_v54  ;;  %vm1778_vm11 = vcmp.eq.s32.totalorder %v4137_v12, %v5556_v36  ;;  %v1999_v54 = vsel %vm1781_vm14, %v4748_v38, 0.0  ;;  %v5565_v36 = vld [vmem:[#allocation43_spill] sm:$0xff] }
 0x3b0   :  { %v1996_v59 = vsel %vm1778_vm11, %v4748_v38, 0.0  ;;  %vm1784_vm2 = vcmp.eq.s32.totalorder %v4137_v12, %v5565_v36 }
 0x3b1   :  { %v2262_v9 = vsel %vm86_vm1, %v1996_v59, 0.0  ;;  %v2002_v59 = vsel %vm1784_vm2, %v4748_v38, 0.0 }
 0x3b2   :  { %2191 = vadd.xlane.f32.xlu1 %v2190_v60  ;;  %2188 = vadd.xlane.f32.xlu0 %v2187_v28  ;;  %v1995_v60 = vsel %vm1777_vm10, %v4748_v38, 0.0  ;;  %v4784_v28 = vpop.permute.xlu1 %1655  ;;  %v2280_v26 = vsel %vm86_vm1, %v2002_v59, 0.0 }
 0x3b3   :  { %5557 = vst [vmem:[#allocation33_spill] sm:$0xff] %v4784_v28 }
 0x3b6   :  { %2197 = vadd.xlane.f32.xlu1 %v2196_v2  ;;  %2194 = vadd.xlane.f32.xlu0 %v2193_v25  ;;  %v2259_v2 = vsel %vm86_vm1, %v1995_v60, 0.0  ;;  %v1998_v25 = vsel %vm1780_vm13, %v4748_v38, 0.0  ;;  %v4800_v34 = vpop.permute.xlu1 %1663  ;;  %v2001_v60 = vsel %vm1783_vm0, %v4748_v38, 0.0 }
 0x3b7   :  { %5563 = vst [vmem:[#allocation35_spill] sm:$0xff] %v4800_v34 }
 0x3ba   :  { %2251 = vadd.xlane.f32.xlu1 %v2250_v41  ;;  %2248 = vadd.xlane.f32.xlu0 %v2247_v42  ;;  %v4802_v41 = vpop.permute.xlu0 %1667  ;;  %v2268_v42 = vsel %vm86_vm1, %v1998_v25, 0.0  ;;  %v4816_v24 = vpop.permute.xlu1 %1671  ;;  %v1885_v25 = vcombine.high %v4555_v11, %v4555_v11 }
 0x3bb   :  { %5564 = vst [vmem:[#allocation36_spill] sm:$0xff] %v4802_v41  ;;  %5566 = vst [vmem:[#allocation37_spill] sm:$0xff] %v4816_v24  ;;  %v5593_v24 = vld [vmem:[#allocation32_spill] sm:$0xff] }
 0x3be   :  { %2257 = vadd.xlane.f32.xlu1 %v2256_v21  ;;  %2254 = vadd.xlane.f32.xlu0 %v2253_v22  ;;  %v2274_v21 = vsel %vm86_vm1, %v2000_v6, 0.0  ;;  %v2271_v22 = vsel %vm86_vm1, %v1999_v54, 0.0  ;;  %v4818_v44 = vpop.permute.xlu0 %1675  ;;  %v4834_v52 = vpop.permute.xlu1 %1679  ;;  %v2006_v6 = vsel %vm1788_vm6, %v4748_v38, 0.0  ;;  %v5571_v54 = vld [vmem:[#allocation17_spill] sm:$0xff] }
 0x3bf   :  { %5567 = vst [vmem:[#allocation38_spill] sm:$0xff] %v4818_v44  ;;  %5569 = vst [vmem:[#allocation39_spill] sm:$0xff] %v4834_v52  ;;  %vm1757_vm7 = vcmp.eq.s32.totalorder %v4137_v12, %v5571_v54  ;;  %v2292_v36 = vsel %vm86_vm1, %v2006_v6, 0.0  ;;  %v5592_v52 = vld [vmem:[#allocation31_spill] sm:$0xff] }
 0x3c2   :  { %2263 = vadd.xlane.f32.xlu1 %v2262_v9  ;;  %2260 = vadd.xlane.f32.xlu0 %v2259_v2  ;;  %v5568_v9 = vld [vmem:[#allocation44_spill] sm:$0xff]  ;;  %v2277_v2 = vsel %vm86_vm1, %v2001_v60, 0.0  ;;  %v4836_v30 = vpop.permute.xlu0 %1683  ;;  %v4853_v60 = vpop.permute.xlu1 %1687 }
 0x3c3   :  { %vm1785_vm3 = vcmp.eq.s32.totalorder %v4137_v12, %v5568_v9  ;;  %5570 = vst [vmem:[#allocation40_spill] sm:$0xff] %v4836_v30  ;;  %5573 = vst [vmem:[#allocation41_spill] sm:$0xff] %v4853_v60  ;;  %v2592_v60 = vadd.s32 4294967264, %v4137_v12  ;;  %v5591_v30 = vld [vmem:[#allocation30_spill] sm:$0xff] }
 0x3c4   :  { %v2003_v17 = vsel %vm1785_vm3, %v4748_v38, 0.0  ;;  %v5575_v38 = vld [vmem:[#allocation19_spill] sm:$0xff]  ;;  %vm1770_vm6 = vcmp.eq.s32.totalorder %v4137_v12, %v5591_v30 }
 0x3c5   :  { %v2283_v11 = vsel %vm86_vm1, %v2003_v17, 0.0  ;;  %vm1759_vm9 = vcmp.eq.s32.totalorder %v4137_v12, %v5575_v38  ;;  %v5582_v38 = vld [vmem:[#allocation24_spill] sm:$0xff] }
 0x3c6   :  { %2269 = vadd.xlane.f32.xlu1 %v2268_v42  ;;  %2266 = vadd.xlane.f32.xlu0 %v2265_v45  ;;  %v2286_v42 = vsel %vm86_vm1, %v2004_v40, 0.0  ;;  %v4841_v45 = vrot.slane %v1885_v25, %v4092_v51  ;;  %v4855_v9 = vpop.permute.xlu0 %1691  ;;  %v4869_v6 = vpop.permute.xlu1 %1695  ;;  %vm1764_vm14 = vcmp.eq.s32.totalorder %v4137_v12, %v5582_v38  ;;  %v5587_v38 = vld [vmem:[#allocation26_spill] sm:$0xff] }
 0x3c7   :  { %5574 = vst [vmem:[#allocation42_spill] sm:$0xff] %v4855_v9  ;;  %5579 = vst [vmem:[#allocation43_spill] sm:$0xff] %v4869_v6  ;;  %vm1766_vm0 = vcmp.eq.s32.totalorder %v4137_v12, %v5587_v38  ;;  %v2599_v6 = vadd.s32 4294967256, %v4137_v12 }
 0x3c8   :  { %v1975_v59 = vsel %vm1757_vm7, %v4841_v45, 0.0  ;;  %v1977_v17 = vsel %vm1759_vm9, %v4841_v45, 0.0  ;;  %vm1771_vm7 = vcmp.eq.s32.totalorder %v4137_v12, %v5592_v52  ;;  %vm2583_vm9 = vcmask 195712  }
 0x3c9   :  { %v2199_v25 = vsel %vm86_vm1, %v1975_v59, 0.0  ;;  %v2205_v18 = vsel %vm86_vm1, %v1977_v17, 0.0  ;;  %v5581_v59 = vld [vmem:[#allocation23_spill] sm:$0xff]  ;;  %v2634_v52 = vadd.s32 4294967216, %v4137_v12 }
 0x3ca   :  { %2275 = vadd.xlane.f32.xlu1 %v2274_v21  ;;  %2272 = vadd.xlane.f32.xlu0 %v2271_v22  ;;  %v2289_v21 = vsel %vm86_vm1, %v2005_v63, 0.0  ;;  %v1976_v22 = vsel %vm1758_vm8, %v4841_v45, 0.0  ;;  %v4871_v63 = vpop.permute.xlu0 %1699  ;;  %vm1763_vm13 = vcmp.eq.s32.totalorder %v4137_v12, %v5581_v59  ;;  %v4886_v17 = vpop.permute.xlu1 %1703  ;;  %v5586_v59 = vld [vmem:[#allocation25_spill] sm:$0xff]  ;;  %vm1772_vm8 = vcmp.eq.s32.totalorder %v4137_v12, %v5593_v24 }
 0x3cb   :  { %5580 = vst [vmem:[#allocation44_spill] sm:$0xff] %v4871_v63  ;;  %5583 = vst [vmem:[#allocation17_spill] sm:$0xff] %v4886_v17  ;;  %vm1765_vm15 = vcmp.eq.s32.totalorder %v4137_v12, %v5586_v59  ;;  %v5589_v17 = vld [vmem:[#allocation28_spill] sm:$0xff]  ;;  %v5590_v59 = vld [vmem:[#allocation29_spill] sm:$0xff] }
 0x3cc   :  { %vm1768_vm3 = vcmp.eq.s32.totalorder %v4137_v12, %v5589_v17  ;;  %v1983_v63 = vsel %vm1765_vm15, %v4841_v45, 0.0  ;;  %vm1769_vm4 = vcmp.eq.s32.totalorder %v4137_v12, %v5590_v59  ;;  %v2620_v59 = vadd.s32 4294967232, %v4137_v12 }
 0x3cd   :  { %v2223_v44 = vsel %vm86_vm1, %v1983_v63, 0.0  ;;  %vm2611_vm15 = vcmask 458112  }
 0x3ce   :  { %2281 = vadd.xlane.f32.xlu1 %v2280_v26  ;;  %2278 = vadd.xlane.f32.xlu0 %v2277_v2  ;;  %v5576_v26 = vld [vmem:[#allocation20_spill] sm:$0xff]  ;;  %v2202_v2 = vsel %vm86_vm1, %v1976_v22, 0.0  ;;  %v2571_v22 = vadd.s32 4294967288, %v4137_v12 }
 0x3cf   :  { %vm1760_vm10 = vcmp.eq.s32.totalorder %v4137_v12, %v5576_v26 }
 0x3d0   :  { %v1978_v40 = vsel %vm1760_vm10, %v4841_v45, 0.0  ;;  %vm2590_vm10 = vcmask 261312  }
 0x3d1   :  { %v2208_v54 = vsel %vm86_vm1, %v1978_v40, 0.0  ;;  %v1981_v40 = vsel %vm1763_vm13, %v4841_v45, 0.0  ;;  %vm2597_vm13 = vcmask 326912  }
 0x3d2   :  { %2287 = vadd.xlane.f32.xlu1 %v2286_v42  ;;  %2284 = vadd.xlane.f32.xlu0 %v2283_v11  ;;  %v5577_v42 = vld [vmem:[#allocation21_spill] sm:$0xff]  ;;  %v5578_v11 = vld [vmem:[#allocation22_spill] sm:$0xff] }
 0x3d3   :  { %vm1761_vm11 = vcmp.eq.s32.totalorder %v4137_v12, %v5577_v42  ;;  %vm1762_vm12 = vcmp.eq.s32.totalorder %v4137_v12, %v5578_v11  ;;  %v4888_v42 = vpop.permute.xlu0 %1707  ;;  %v2585_v11 = vadd.s32 4294967272, %v4137_v12 }
 0x3d4   :  { %5584 = vst [vmem:[#allocation18_spill] sm:$0xff] %v4888_v42  ;;  %v5588_v42 = vld [vmem:[#allocation27_spill] sm:$0xff] }
 0x3d5   :  { %vm1767_vm2 = vcmp.eq.s32.totalorder %v4137_v12, %v5588_v42 }
 0x3d6   :  { %2293 = vadd.xlane.f32.xlu1 %v2292_v36  ;;  %2290 = vadd.xlane.f32.xlu0 %v2289_v21  ;;  %v1980_v36 = vsel %vm1762_vm12, %v4841_v45, 0.0  ;;  %v1979_v21 = vsel %vm1761_vm11, %v4841_v45, 0.0  ;;  %vm1789_vm11 = vcmp.eq.s32.totalorder %v4137_v12, %v4494_v14  ;;  %vm1790_vm12 = vcmp.eq.s32.totalorder %v4137_v12, %v4496_v35 }
 0x3d7   :  { %v2214_v26 = vsel %vm86_vm1, %v1980_v36, 0.0  ;;  %v2648_v14 = vadd.s32 4294967200, %v4137_v12 }
 0x3da   :  { %2203 = vadd.xlane.f32.xlu1 %v2202_v2  ;;  %2200 = vadd.xlane.f32.xlu0 %v2199_v25  ;;  %v2211_v2 = vsel %vm86_vm1, %v1979_v21, 0.0  ;;  %v1982_v25 = vsel %vm1764_vm14, %v4841_v45, 0.0  ;;  %v2578_v21 = vadd.s32 4294967280, %v4137_v12  ;;  %vm2604_vm14 = vcmask 392512  }
 0x3de   :  { %2209 = vadd.xlane.f32.xlu1 %v2208_v54  ;;  %2206 = vadd.xlane.f32.xlu0 %v2205_v18  ;;  %v5585_v54 = vld [vmem:[#allocation15_spill] sm:$0xff] }
 0x3df   :  { %v4893_v18 = vsub.s32 %v4137_v12, %v5585_v54  ;;  %v4896_v36 = vsub.s32 %v2571_v22, %v5585_v54  ;;  %v1984_v22 = vsel %vm1766_vm0, %v4841_v45, 0.0  ;;  %v4941_v41 = vsub.s32 %v2599_v6, %v5585_v54 }
 0x3e0   :  { %v4947_v17 = vsub.s32 %v2592_v60, %v5585_v54  ;;  %v1988_v60 = vsel %vm1770_vm6, %v4841_v45, 0.0  ;;  %vm5516_vm0 = vcmask 523712   ;;  %vm1791_vm6 = vcmp.eq.s32.totalorder %v4137_v12, %v4510_v3 }
 0x3e2   :  { %2215 = vadd.xlane.f32.xlu1 %v2214_v26  ;;  %2212 = vadd.xlane.f32.xlu0 %v2211_v2  ;;  %v2220_v26 = vsel %vm86_vm1, %v1982_v25, 0.0  ;;  %v2217_v2 = vsel %vm86_vm1, %v1981_v40, 0.0  ;;  %v4914_v40 = vsub.s32 %v2585_v11, %v5585_v54  ;;  %v2226_v11 = vsel %vm86_vm1, %v1984_v22, 0.0 }
 0x3e6   :  { %2221 = vadd.xlane.f32.xlu1 %v2220_v26  ;;  %2218 = vadd.xlane.f32.xlu0 %v2217_v2  ;;  %v4920_v2 = vsub.s32 %v2578_v21, %v5585_v54  ;;  %v1986_v21 = vsel %vm1768_vm3, %v4841_v45, 0.0  ;;  %vm5517_vm3 = vcmask 589312  }
 0x3e7   :  { %v2057_v38 = vpop.xlane.xlu1 %2056  ;;  %v2060_v25 = vpop.xlane.xlu0 %2059  ;;  %v2232_v6 = vsel %vm86_vm1, %v1986_v21, 0.0 }
 0x3e8   :  { %v2570_v9 = vrot.slane %v2057_v38, %v4893_v18  ;;  %v2575_v26 = vrot.slane %v2060_v25, %v4896_v36  ;;  %v1985_v25 = vsel %vm1767_vm2, %v4841_v45, 0.0  ;;  %vm1805_vm2 = vcmp.eq.s32.totalorder %v4137_v12, %v4631_v37 }
 0x3e9   :  { %v2229_v42 = vsel %vm86_vm1, %v1985_v25, 0.0  ;;  %v2662_v37 = vadd.s32 4294967184, %v4137_v12 }
 0x3ea   :  { %v2577_v38 = vsel %vm2576_vm5, %v2575_v26, %v2570_v9  ;;  %2227 = vadd.xlane.f32.xlu1 %v2226_v11  ;;  %2224 = vadd.xlane.f32.xlu0 %v2223_v44  ;;  %v2613_v9 = vadd.s32 4294967240, %v4137_v12  ;;  %v2606_v11 = vadd.s32 4294967248, %v4137_v12 }
 0x3eb   :  { %v2066_v22 = vpop.xlane.xlu1 %2065  ;;  %v2063_v63 = vpop.xlane.xlu0 %2062 }
 0x3ec   :  { %v2589_v44 = vrot.slane %v2066_v22, %v4914_v40  ;;  %v2582_v26 = vrot.slane %v2063_v63, %v4920_v2  ;;  %v1987_v22 = vsel %vm1769_vm4, %v4841_v45, 0.0  ;;  %v4967_v25 = vsub.s32 %v2613_v9, %v5585_v54 }
 0x3ed   :  { %v2238_v9 = vsel %vm86_vm1, %v1988_v60, 0.0  ;;  %v2235_v28 = vsel %vm86_vm1, %v1987_v22, 0.0  ;;  %vm5512_vm4 = vcmask 654912  }
 0x3ee   :  { %v2584_v34 = vsel %vm2583_vm9, %v2582_v26, %v2577_v38  ;;  %2233 = vadd.xlane.f32.xlu1 %v2232_v6  ;;  %2230 = vadd.xlane.f32.xlu0 %v2229_v42  ;;  %v2627_v38 = vadd.s32 4294967224, %v4137_v12  ;;  %v4973_v6 = vsub.s32 %v2606_v11, %v5585_v54  ;;  %v1884_v42 = vcombine.high %v4475_v39, %v4475_v39 }
 0x3ef   :  { %v2072_v63 = vpop.xlane.xlu1 %2071  ;;  %v2591_v21 = vsel %vm2590_vm10, %v2589_v44, %v2584_v34  ;;  %v2069_v23 = vpop.xlane.xlu0 %2068  ;;  %v5594_v34 = vld [vmem:[#allocation45_spill] sm:$0xff]  ;;  %v1989_v39 = vsel %vm1771_vm7, %v4841_v45, 0.0  ;;  %vm1806_vm7 = vcmp.eq.s32.totalorder %v4137_v12, %v4633_v16 }
 0x3f0   :  { %v2603_v26 = vrot.slane %v2072_v63, %v4941_v41  ;;  %v2596_v30 = vrot.slane %v2069_v23, %v4947_v17  ;;  %v4980_v44 = vrot.slane %v5594_v34, %v4092_v51  ;;  %v1990_v23 = vsel %vm1772_vm8, %v4841_v45, 0.0 }
 0x3f1   :  { %v4995_v22 = vsub.s32 %v2627_v38, %v5585_v54  ;;  %v5007_v45 = vrot.slane %v1884_v42, %v4092_v51  ;;  %v2244_v38 = vsel %vm86_vm1, %v1990_v23, 0.0  ;;  %vm5514_vm8 = vcmask 720512  }
 0x3f2   :  { %v2598_v63 = vsel %vm2597_vm13, %v2596_v30, %v2591_v21  ;;  %2239 = vadd.xlane.f32.xlu1 %v2238_v9  ;;  %2236 = vadd.xlane.f32.xlu0 %v2235_v28  ;;  %v2641_v28 = vadd.s32 4294967208, %v4137_v12  ;;  %v5001_v30 = vsub.s32 %v2620_v59, %v5585_v54  ;;  %v2007_v59 = vsel %vm1789_vm11, %v4980_v44, 0.0 }
 0x3f3   :  { %v2078_v11 = vpop.xlane.xlu1 %2077  ;;  %v2605_v60 = vsel %vm2604_vm14, %v2603_v26, %v2598_v63  ;;  %v2075_v19 = vpop.xlane.xlu0 %2074  ;;  %v2241_v26 = vsel %vm86_vm1, %v1989_v39, 0.0  ;;  %vm5513_vm11 = vcmask 786112  }
 0x3f4   :  { %v2617_v21 = vrot.slane %v2078_v11, %v4967_v25  ;;  %v2610_v24 = vrot.slane %v2075_v19, %v4973_v6  ;;  %v2008_v19 = vsel %vm1790_vm12, %v4980_v44, 0.0  ;;  %v5022_v39 = vsub.s32 %v2641_v28, %v5585_v54 }
 0x3f5   :  { %v2655_v11 = vadd.s32 4294967192, %v4137_v12  ;;  %v2298_v28 = vsel %vm86_vm1, %v2008_v19, 0.0  ;;  %vm1792_vm12 = vcmp.eq.s32.totalorder %v4137_v12, %v4512_v4 }
 0x3f6   :  { %v2612_v9 = vsel %vm2611_vm15, %v2610_v24, %v2605_v60  ;;  %2245 = vadd.xlane.f32.xlu1 %v2244_v38  ;;  %2242 = vadd.xlane.f32.xlu0 %v2241_v26  ;;  %v5028_v24 = vsub.s32 %v2634_v52, %v5585_v54  ;;  %v2023_v52 = vsel %vm1805_vm2, %v5007_v45, 0.0  ;;  %v2009_v26 = vsel %vm1791_vm6, %v4980_v44, 0.0 }
 0x3f7   :  { %v2084_v42 = vpop.xlane.xlu1 %2083  ;;  %v2619_v63 = vsel %vm5516_vm0, %v2617_v21, %v2612_v9  ;;  %v2081_v23 = vpop.xlane.xlu0 %2080  ;;  %v2295_v21 = vsel %vm86_vm1, %v2007_v59, 0.0  ;;  %v5045_v19 = vsub.s32 %v2655_v11, %v5585_v54  ;;  %v2669_v59 = vadd.s32 4294967176, %v4137_v12 }
 0x3f8   :  { %v2631_v60 = vrot.slane %v2084_v42, %v4995_v22  ;;  %v2624_v35 = vrot.slane %v2081_v23, %v5001_v30  ;;  %v2301_v11 = vsel %vm86_vm1, %v2009_v26, 0.0  ;;  %vm1807_vm2 = vcmp.eq.s32.totalorder %v4137_v12, %v4649_v53 }
 0x3f9   :  { %vm5515_vm6 = vcmask 851712  }
 0x3fa   :  { %v2626_v38 = vsel %vm5517_vm3, %v2624_v35, %v2619_v63  ;;  %2299 = vadd.xlane.f32.xlu1 %v2298_v28  ;;  %2296 = vadd.xlane.f32.xlu0 %v2295_v21  ;;  %v5051_v35 = vsub.s32 %v2648_v14, %v5585_v54  ;;  %v2010_v21 = vsel %vm1792_vm12, %v4980_v44, 0.0  ;;  %v2024_v14 = vsel %vm1806_vm7, %v5007_v45, 0.0 }
 0x3fb   :  { %v2090_v3 = vpop.xlane.xlu1 %2089  ;;  %v2633_v9 = vsel %vm5512_vm4, %v2631_v60, %v2626_v38  ;;  %v2087_v42 = vpop.xlane.xlu0 %2086  ;;  %v2343_v60 = vsel %vm86_vm1, %v2023_v52, 0.0  ;;  %vm2660_vm4 = vcmask 917312   ;;  %vm1793_vm7 = vcmp.eq.s32.totalorder %v4137_v12, %v4526_v57 }
 0x3fc   :  { %v2645_v63 = vrot.slane %v2090_v3, %v5022_v39  ;;  %v2638_v23 = vrot.slane %v2087_v42, %v5028_v24  ;;  %v5073_v42 = vsub.s32 %v2662_v37, %v5585_v54  ;;  %v2304_v16 = vsel %vm86_vm1, %v2010_v21, 0.0 }
 0x3fd   :  { %vm1808_vm12 = vcmp.eq.s32.totalorder %v4137_v12, %v4651_v5 }
 0x3fe   :  { %v2640_v28 = vsel %vm5514_vm8, %v2638_v23, %v2633_v9  ;;  %2344 = vadd.xlane.f32.xlu1 %v2343_v60  ;;  %2302 = vadd.xlane.f32.xlu0 %v2301_v11  ;;  %v5070_v9 = vsub.s32 %v2669_v59, %v5585_v54  ;;  %v2011_v60 = vsel %vm1793_vm7, %v4980_v44, 0.0  ;;  %v2025_v59 = vsel %vm1807_vm2, %v5007_v45, 0.0 }
 0x3ff   :  { %v2096_v38 = vpop.xlane.xlu1 %2095  ;;  %v2647_v4 = vsel %vm5513_vm11, %v2645_v63, %v2640_v28  ;;  %v2093_v52 = vpop.xlane.xlu0 %2092  ;;  %v2346_v63 = vsel %vm86_vm1, %v2024_v14, 0.0  ;;  %vm1809_vm11 = vcmp.eq.s32.totalorder %v4137_v12, %v4668_v46  ;;  %vm2667_vm8 = vcmask 982912  }
 0x400   :  { %v2659_v26 = vrot.slane %v2096_v38, %v5045_v19  ;;  %v2652_v3 = vrot.slane %v2093_v52, %v5051_v35  ;;  %v2307_v21 = vsel %vm86_vm1, %v2011_v60, 0.0  ;;  %v2349_v53 = vsel %vm86_vm1, %v2025_v59, 0.0 }
 0x401   :  { %v2027_v5 = vsel %vm1809_vm11, %v5007_v45, 0.0  ;;  %v2026_v46 = vsel %vm1808_vm12, %v5007_v45, 0.0  ;;  %vm1794_vm2 = vcmp.eq.s32.totalorder %v4137_v12, %v4528_v56  ;;  %vm1795_vm7 = vcmp.eq.s32.totalorder %v4137_v12, %v4544_v15 }
 0x402   :  { %v2654_v23 = vsel %vm5515_vm6, %v2652_v3, %v2647_v4  ;;  %2305 = vadd.xlane.f32.xlu1 %v2304_v16  ;;  %2347 = vadd.xlane.f32.xlu0 %v2346_v63  ;;  %vm2674_vm6 = vcmask 1048512   ;;  %v2355_v16 = vsel %vm86_vm1, %v2027_v5, 0.0  ;;  %v2352_v63 = vsel %vm86_vm1, %v2026_v46, 0.0 }
 0x403   :  { %v2102_v57 = vpop.xlane.xlu1 %2101  ;;  %v2661_v54 = vsel %vm2660_vm4, %v2659_v26, %v2654_v23  ;;  %v2099_v37 = vpop.xlane.xlu0 %2098  ;;  %v2013_v56 = vsel %vm1795_vm7, %v4980_v44, 0.0  ;;  %v2012_v15 = vsel %vm1794_vm2, %v4980_v44, 0.0  ;;  %vm1810_vm11 = vcmp.eq.s32.totalorder %v4137_v12, %v4670_v20 }
 0x404   :  { %v2673_v11 = vrot.slane %v2102_v57, %v5070_v9  ;;  %v2666_v28 = vrot.slane %v2099_v37, %v5073_v42  ;;  %vm1811_vm12 = vcmp.eq.s32.totalorder %v4137_v12, %v4684_v1  ;;  %v2313_v37 = vsel %vm86_vm1, %v2013_v56, 0.0 }
 0x405   :  { %v2028_v20 = vsel %vm1810_vm11, %v5007_v45, 0.0  ;;  %vm1796_vm2 = vcmp.eq.s32.totalorder %v4137_v12, %v4546_v58  ;;  %vm1797_vm7 = vcmp.eq.s32.totalorder %v4137_v12, %v4563_v50  ;;  %vm1812_vm11 = vcmp.eq.s32.totalorder %v4137_v12, %v4686_v7 }
 0x406   :  { %v2668_v14 = vsel %vm2667_vm8, %v2666_v28, %v2661_v54  ;;  %2308 = vadd.xlane.f32.xlu1 %v2307_v21  ;;  %2350 = vadd.xlane.f32.xlu0 %v2349_v53  ;;  %v2029_v21 = vsel %vm1811_vm12, %v5007_v45, 0.0  ;;  %v2015_v58 = vsel %vm1797_vm7, %v4980_v44, 0.0  ;;  %v2014_v50 = vsel %vm1796_vm2, %v4980_v44, 0.0 }
 0x407   :  { %v5102_v38 = vsel %vm2674_vm6, %v2673_v11, %v2668_v14  ;;  %v2108_v4 = vpop.xlane.xlu1 %2107  ;;  %v2105_v52 = vpop.xlane.xlu0 %2104  ;;  %v2310_v11 = vsel %vm86_vm1, %v2012_v15, 0.0  ;;  %vm1813_vm12 = vcmp.eq.s32.totalorder %v4137_v12, %v4700_v29  ;;  %v2319_v15 = vsel %vm86_vm1, %v2015_v58, 0.0 }
 0x408   :  { %v2683_v26 = vrot.slane %v2108_v4, %v4896_v36  ;;  %v2679_v3 = vrot.slane %v2105_v52, %v4893_v18  ;;  %v2361_v4 = vsel %vm86_vm1, %v2029_v21, 0.0  ;;  %v2358_v52 = vsel %vm86_vm1, %v2028_v20, 0.0 }
 0x409   :  { %v2031_v7 = vsel %vm1813_vm12, %v5007_v45, 0.0  ;;  %v2030_v29 = vsel %vm1812_vm11, %v5007_v45, 0.0  ;;  %vm1798_vm2 = vcmp.eq.s32.totalorder %v4137_v12, %v4565_v55  ;;  %vm1799_vm7 = vcmp.eq.s32.totalorder %v4137_v12, %v4583_v43 }
 0x40a   :  { %v2684_v23 = vsel %vm2576_vm5, %v2683_v26, %v2679_v3  ;;  %2356 = vadd.xlane.f32.xlu1 %v2355_v16  ;;  %2353 = vadd.xlane.f32.xlu0 %v2352_v63  ;;  %v2367_v21 = vsel %vm86_vm1, %v2031_v7, 0.0  ;;  %v2364_v20 = vsel %vm86_vm1, %v2030_v29, 0.0  ;;  %v2017_v55 = vsel %vm1799_vm7, %v4980_v44, 0.0 }
 0x40b   :  { %v2114_v60 = vpop.xlane.xlu1 %2113  ;;  %v2111_v59 = vpop.xlane.xlu0 %2110  ;;  %v2016_v43 = vsel %vm1798_vm2, %v4980_v44, 0.0  ;;  %vm1814_vm11 = vcmp.eq.s32.totalorder %v4137_v12, %v4702_v48  ;;  %vm1815_vm12 = vcmp.eq.s32.totalorder %v4137_v12, %v4716_v13  ;;  %vm5596_vm7 = vcmask 720512  }
 0x40c   :  { %v2693_v57 = vrot.slane %v2114_v60, %v4914_v40  ;;  %v2688_v54 = vrot.slane %v2111_v59, %v4920_v2  ;;  %v2316_v60 = vsel %vm86_vm1, %v2014_v50, 0.0  ;;  %v2033_v48 = vsel %vm1815_vm12, %v5007_v45, 0.0 }
 0x40d   :  { %v2032_v13 = vsel %vm1814_vm11, %v5007_v45, 0.0  ;;  %vm1801_vm2 = vcmp.eq.s32.totalorder %v4137_v12, %v4599_v32  ;;  %vm5598_vm12 = vcmask 851712   ;;  %vm1817_vm11 = vcmp.eq.s32.totalorder %v4137_v12, %v4732_v47 }
 0x40e   :  { %v2689_v28 = vsel %vm2583_vm9, %v2688_v54, %v2684_v23  ;;  %2314 = vadd.xlane.f32.xlu1 %v2313_v37  ;;  %2311 = vadd.xlane.f32.xlu0 %v2310_v11 }
 0x40f   :  { %v2120_v1 = vpop.xlane.xlu1 %2119  ;;  %v2694_v53 = vsel %vm2590_vm10, %v2693_v57, %v2689_v28  ;;  %v2117_v14 = vpop.xlane.xlu0 %2116 }
 0x410   :  { %v2703_v5 = vrot.slane %v2120_v1, %v4941_v41  ;;  %v2698_v46 = vrot.slane %v2117_v14, %v4947_v17 }
 0x412   :  { %v2699_v26 = vsel %vm2597_vm13, %v2698_v46, %v2694_v53  ;;  %2362 = vadd.xlane.f32.xlu1 %v2361_v4  ;;  %2359 = vadd.xlane.f32.xlu0 %v2358_v52  ;;  %v2325_v52 = vsel %vm86_vm1, %v2017_v55, 0.0 }
 0x413   :  { %v2126_v3 = vpop.xlane.xlu1 %2125  ;;  %v2704_v16 = vsel %vm2604_vm14, %v2703_v5, %v2699_v26  ;;  %v2123_v63 = vpop.xlane.xlu0 %2122  ;;  %v2322_v26 = vsel %vm86_vm1, %v2016_v43, 0.0 }
 0x414   :  { %v2713_v23 = vrot.slane %v2126_v3, %v4967_v25  ;;  %v2708_v56 = vrot.slane %v2123_v63, %v4973_v6 }
 0x416   :  { %v2709_v59 = vsel %vm2611_vm15, %v2708_v56, %v2704_v16  ;;  %2320 = vadd.xlane.f32.xlu1 %v2319_v15  ;;  %2317 = vadd.xlane.f32.xlu0 %v2316_v60  ;;  %v2373_v56 = vsel %vm86_vm1, %v2033_v48, 0.0  ;;  %v2370_v15 = vsel %vm86_vm1, %v2032_v13, 0.0  ;;  %v1886_v13 = vcombine.high %v5594_v34, %v5594_v34 }
 0x417   :  { %v2132_v57 = vpop.xlane.xlu1 %2131  ;;  %v2714_v54 = vsel %vm5516_vm0, %v2713_v23, %v2709_v59  ;;  %v2129_v37 = vpop.xlane.xlu0 %2128  ;;  %vm5595_vm0 = vcmask 654912  }
 0x418   :  { %v2723_v11 = vrot.slane %v2132_v57, %v4995_v22  ;;  %v2718_v28 = vrot.slane %v2129_v37, %v5001_v30 }
 0x41a   :  { %v2719_v1 = vsel %vm5517_vm3, %v2718_v28, %v2714_v54  ;;  %2368 = vadd.xlane.f32.xlu1 %v2367_v21  ;;  %2365 = vadd.xlane.f32.xlu0 %v2364_v20  ;;  %vm5597_vm3 = vcmask 786112  }
 0x41b   :  { %v2138_v53 = vpop.xlane.xlu1 %2137  ;;  %v2724_v14 = vsel %vm5595_vm0, %v2723_v11, %v2719_v1  ;;  %v2135_v5 = vpop.xlane.xlu0 %2134  ;;  %vm1800_vm0 = vcmp.eq.s32.totalorder %v4137_v12, %v4585_v49  ;;  %v2019_v49 = vsel %vm1801_vm2, %v4980_v44, 0.0  ;;  %vm1803_vm2 = vcmp.eq.s32.totalorder %v4137_v12, %v4615_v8 }
 0x41c   :  { %v2733_v46 = vrot.slane %v2138_v53, %v5022_v39  ;;  %v2728_v4 = vrot.slane %v2135_v5, %v5028_v24  ;;  %v2018_v32 = vsel %vm1800_vm0, %v4980_v44, 0.0  ;;  %v2331_v37 = vsel %vm86_vm1, %v2019_v49, 0.0 }
 0x41d   :  { %v2328_v11 = vsel %vm86_vm1, %v2018_v32, 0.0  ;;  %vm1802_vm0 = vcmp.eq.s32.totalorder %v4137_v12, %v4601_v0  ;;  %v2021_v8 = vsel %vm1803_vm2, %v4980_v44, 0.0  ;;  %v5599_v32 = vld [vmem:[#allocation16_spill] sm:$0xff] }
 0x41e   :  { %v2729_v58 = vsel %vm5596_vm7, %v2728_v4, %v2724_v14  ;;  %2326 = vadd.xlane.f32.xlu1 %v2325_v52  ;;  %2323 = vadd.xlane.f32.xlu0 %v2322_v26  ;;  %vm3229_vm7 = vcmask 1041409   ;;  %vm1822_vm2 = vcmp.eq.s32.totalorder %v4137_v12, %v5599_v32 }
 0x41f   :  { %v2144_v50 = vpop.xlane.xlu1 %2143  ;;  %v2734_v3 = vsel %vm5597_vm3, %v2733_v46, %v2729_v58  ;;  %v2141_v16 = vpop.xlane.xlu0 %2140  ;;  %vm1816_vm3 = vcmp.eq.s32.totalorder %v4137_v12, %v4718_v27  ;;  %v2035_v27 = vsel %vm1817_vm11, %v5007_v45, 0.0  ;;  %v2020_v46 = vsel %vm1802_vm0, %v4980_v44, 0.0 }
 0x420   :  { %v2743_v63 = vrot.slane %v2144_v50, %v5045_v19  ;;  %v2738_v23 = vrot.slane %v2141_v16, %v5051_v35  ;;  %v2034_v47 = vsel %vm1816_vm3, %v5007_v45, 0.0  ;;  %v2379_v14 = vsel %vm86_vm1, %v2035_v27, 0.0 }
 0x421   :  { %v2376_v5 = vsel %vm86_vm1, %v2034_v47, 0.0  ;;  %vm1819_vm3 = vcmp.eq.s32.totalorder %v4137_v12, %v4752_v33  ;;  %v2337_v58 = vsel %vm86_vm1, %v2021_v8, 0.0  ;;  %v2334_v48 = vsel %vm86_vm1, %v2020_v46, 0.0  ;;  %v5604_v8 = vld [vmem:[#allocation35_spill] sm:$0xff]  ;;  %v5605_v46 = vld [vmem:[#allocation36_spill] sm:$0xff] }
 0x422   :  { %v2739_v60 = vsel %vm5598_vm12, %v2738_v23, %v2734_v3  ;;  %2374 = vadd.xlane.f32.xlu1 %v2373_v56  ;;  %2371 = vadd.xlane.f32.xlu0 %v2370_v15  ;;  %vm1818_vm12 = vcmp.eq.s32.totalorder %v4137_v12, %v4734_v62  ;;  %v2037_v62 = vsel %vm1819_vm3, %v5007_v45, 0.0  ;;  %vm1804_vm11 = vcmp.eq.s32.totalorder %v4137_v12, %v4617_v10 }
 0x423   :  { %v2150_v59 = vpop.xlane.xlu1 %2149  ;;  %v2744_v7 = vsel %vm2660_vm4, %v2743_v63, %v2739_v60  ;;  %v2147_v29 = vpop.xlane.xlu0 %2146  ;;  %v2036_v33 = vsel %vm1818_vm12, %v5007_v45, 0.0  ;;  %v2385_v56 = vsel %vm86_vm1, %v2037_v62, 0.0  ;;  %v5232_v60 = vrot.slane %v1886_v13, %v4092_v51 }
 0x424   :  { %v2753_v57 = vrot.slane %v2150_v59, %v5070_v9  ;;  %v2748_v54 = vrot.slane %v2147_v29, %v5073_v42  ;;  %v2382_v15 = vsel %vm86_vm1, %v2036_v33, 0.0  ;;  %v2022_v49 = vsel %vm1804_vm11, %v4980_v44, 0.0 }
 0x425   :  { %vm1821_vm0 = vcmp.eq.s32.totalorder %v4137_v12, %v4768_v31  ;;  %vm5602_vm11 = vcmask 523712  }
 0x426   :  { %v2749_v28 = vsel %vm2667_vm8, %v2748_v54, %v2744_v7  ;;  %2332 = vadd.xlane.f32.xlu1 %v2331_v37  ;;  %2329 = vadd.xlane.f32.xlu0 %v2328_v11  ;;  %v2039_v31 = vsel %vm1821_vm0, %v5232_v60, 0.0  ;;  %v2040_v37 = vsel %vm1822_vm2, %v5232_v60, 0.0  ;;  %v5600_v11 = vld [vmem:[#allocation33_spill] sm:$0xff]  ;;  %vm1825_vm0 = vcmp.eq.s32.totalorder %v4137_v12, %v5604_v8 }
 0x427   :  { %v2754_v21 = vsel %vm2674_vm6, %v2753_v57, %v2749_v28  ;;  %v2156_v20 = vpop.xlane.xlu1 %2155  ;;  %v2153_v1 = vpop.xlane.xlu0 %2152  ;;  %vm1823_vm12 = vcmp.eq.s32.totalorder %v4137_v12, %v5600_v11  ;;  %v5601_v28 = vld [vmem:[#allocation34_spill] sm:$0xff]  ;;  %vm1826_vm2 = vcmp.eq.s32.totalorder %v4137_v12, %v5605_v46  ;;  %v2043_v62 = vsel %vm1825_vm0, %v5232_v60, 0.0 }
 0x428   :  { %v5200_v55 = vsel %vm3229_vm7, %v2754_v21, %v5102_v38  ;;  %v2762_v43 = vrot.slane %v2156_v20, %v4896_v36  ;;  %v2758_v53 = vrot.slane %v2153_v1, %v4893_v18  ;;  %vm1820_vm7 = vcmp.eq.s32.totalorder %v4137_v12, %v4754_v61 }
 0x429   :  { %v2038_v61 = vsel %vm1820_vm7, %v5007_v45, 0.0  ;;  %v2340_v45 = vsel %vm86_vm1, %v2022_v49, 0.0  ;;  %vm1824_vm3 = vcmp.eq.s32.totalorder %v4137_v12, %v5601_v28  ;;  %vm5603_vm7 = vcmask 589312  }
 0x42a   :  { %v2763_v0 = vsel %vm2576_vm5, %v2762_v43, %v2758_v53  ;;  %2380 = vadd.xlane.f32.xlu1 %v2379_v14  ;;  %2377 = vadd.xlane.f32.xlu0 %v2376_v5  ;;  %v2388_v54 = vsel %vm86_vm1, %v2038_v61, 0.0  ;;  %v2391_v43 = vsel %vm86_vm1, %v2039_v31, 0.0  ;;  %v2394_v53 = vsel %vm86_vm1, %v2040_v37, 0.0 }
 0x42b   :  { %v2162_v38 = vpop.xlane.xlu1 %2161  ;;  %v2159_v4 = vpop.xlane.xlu0 %2158  ;;  %v2041_v5 = vsel %vm1823_vm12, %v5232_v60, 0.0  ;;  %vm5607_vm12 = vcmask 720512   ;;  %v2044_v33 = vsel %vm1826_vm2, %v5232_v60, 0.0  ;;  %vm5611_vm0 = vcmask 851712  }
 0x42c   :  { %v2772_v52 = vrot.slane %v2162_v38, %v4914_v40  ;;  %v2767_v26 = vrot.slane %v2159_v4, %v4920_v2  ;;  %v2406_v61 = vsel %vm86_vm1, %v2044_v33, 0.0 }
 0x42e   :  { %v2768_v50 = vsel %vm2583_vm9, %v2767_v26, %v2763_v0  ;;  %2338 = vadd.xlane.f32.xlu1 %v2337_v58  ;;  %2335 = vadd.xlane.f32.xlu0 %v2334_v48  ;;  %v2042_v0 = vsel %vm1824_vm3, %v5232_v60, 0.0  ;;  %v2397_v48 = vsel %vm86_vm1, %v2041_v5, 0.0 }
 0x42f   :  { %v2168_v3 = vpop.xlane.xlu1 %2167  ;;  %v2773_v16 = vsel %vm2590_vm10, %v2772_v52, %v2768_v50  ;;  %v2165_v63 = vpop.xlane.xlu0 %2164  ;;  %v2400_v13 = vsel %vm86_vm1, %v2042_v0, 0.0 }
 0x430   :  { %v2782_v34 = vrot.slane %v2168_v3, %v4941_v41  ;;  %v2777_v23 = vrot.slane %v2165_v63, %v4947_v17  ;;  %v5608_v3 = vld [vmem:[#allocation37_spill] sm:$0xff] }
 0x431   :  { %vm1827_vm3 = vcmp.eq.s32.totalorder %v4137_v12, %v5608_v3 }
 0x432   :  { %v2778_v10 = vsel %vm2597_vm13, %v2777_v23, %v2773_v16  ;;  %2386 = vadd.xlane.f32.xlu1 %v2385_v56  ;;  %2383 = vadd.xlane.f32.xlu0 %v2382_v15  ;;  %v5609_v16 = vld [vmem:[#allocation38_spill] sm:$0xff]  ;;  %v2045_v32 = vsel %vm1827_vm3, %v5232_v60, 0.0 }
 0x433   :  { %v2174_v59 = vpop.xlane.xlu1 %2173  ;;  %v2783_v7 = vsel %vm2604_vm14, %v2782_v34, %v2778_v10  ;;  %v2171_v29 = vpop.xlane.xlu0 %2170  ;;  %v2403_v10 = vsel %vm86_vm1, %v2043_v62, 0.0  ;;  %v2409_v31 = vsel %vm86_vm1, %v2045_v32, 0.0 }
 0x434   :  { %v2792_v51 = vrot.slane %v2174_v59, %v4967_v25  ;;  %v2787_v57 = vrot.slane %v2171_v29, %v4973_v6  ;;  %v5613_v29 = vld [vmem:[#allocation40_spill] sm:$0xff] }
 0x436   :  { %v2788_v44 = vsel %vm2611_vm15, %v2787_v57, %v2783_v7  ;;  %2389 = vadd.xlane.f32.xlu1 %v2388_v54  ;;  %2341 = vadd.xlane.f32.xlu0 %v2340_v45  ;;  %v5612_v7 = vld [vmem:[#allocation39_spill] sm:$0xff] }
 0x437   :  { %v2180_v27 = vpop.xlane.xlu1 %2179  ;;  %v2793_v47 = vsel %vm5602_vm11, %v2792_v51, %v2788_v44  ;;  %v2177_v21 = vpop.xlane.xlu0 %2176  ;;  %vm5606_vm11 = vcmask 654912   ;;  %vm1829_vm2 = vcmp.eq.s32.totalorder %v4137_v12, %v5612_v7 }
 0x438   :  { %v2802_v20 = vrot.slane %v2180_v27, %v4995_v22  ;;  %v2797_v1 = vrot.slane %v2177_v21, %v5001_v30  ;;  %v2047_v28 = vsel %vm1829_vm2, %v5232_v60, 0.0  ;;  %v5615_v21 = vld [vmem:[#allocation42_spill] sm:$0xff] }
 0x439   :  { %v2415_v0 = vsel %vm86_vm1, %v2047_v28, 0.0 }
 0x43a   :  { %v2798_v14 = vsel %vm5603_vm7, %v2797_v1, %v2793_v47  ;;  %2392 = vadd.xlane.f32.xlu1 %v2391_v43  ;;  %2395 = vadd.xlane.f32.xlu0 %v2394_v53  ;;  %vm1828_vm7 = vcmp.eq.s32.totalorder %v4137_v12, %v5609_v16  ;;  %v5614_v47 = vld [vmem:[#allocation41_spill] sm:$0xff] }
 0x43b   :  { %v2186_v38 = vpop.xlane.xlu1 %2185  ;;  %v2803_v4 = vsel %vm5606_vm11, %v2802_v20, %v2798_v14  ;;  %v2183_v52 = vpop.xlane.xlu0 %2182  ;;  %vm5610_vm11 = vcmask 786112   ;;  %v2046_v59 = vsel %vm1828_vm7, %v5232_v60, 0.0  ;;  %vm1831_vm3 = vcmp.eq.s32.totalorder %v4137_v12, %v5614_v47 }
 0x43c   :  { %v2812_v26 = vrot.slane %v2186_v38, %v5022_v39  ;;  %v2807_v58 = vrot.slane %v2183_v52, %v5028_v24  ;;  %v2412_v37 = vsel %vm86_vm1, %v2046_v59, 0.0  ;;  %vm1832_vm7 = vcmp.eq.s32.totalorder %v4137_v12, %v5615_v21  ;;  %v5616_v52 = vld [vmem:[#allocation43_spill] sm:$0xff] }
 0x43d   :  { %v2049_v38 = vsel %vm1831_vm3, %v5232_v60, 0.0  ;;  %vm5620_vm3 = vcmask 523712  }
 0x43e   :  { %v2808_v50 = vsel %vm5607_vm12, %v2807_v58, %v2803_v4  ;;  %2398 = vadd.xlane.f32.xlu1 %v2397_v48  ;;  %2401 = vadd.xlane.f32.xlu0 %v2400_v13  ;;  %vm1830_vm12 = vcmp.eq.s32.totalorder %v4137_v12, %v5613_v29  ;;  %v2050_v4 = vsel %vm1832_vm7, %v5232_v60, 0.0  ;;  %vm5621_vm7 = vcmask 589312  }
 0x43f   :  { %v2192_v63 = vpop.xlane.xlu1 %2191  ;;  %v2813_v34 = vsel %vm5610_vm11, %v2812_v26, %v2808_v50  ;;  %v2189_v23 = vpop.xlane.xlu0 %2188  ;;  %vm3231_vm11 = vcmask 1042434   ;;  %v2048_v27 = vsel %vm1830_vm12, %v5232_v60, 0.0  ;;  %v2421_v50 = vsel %vm86_vm1, %v2049_v38, 0.0 }
 0x440   :  { %v2822_v56 = vrot.slane %v2192_v63, %v5045_v19  ;;  %v2817_v15 = vrot.slane %v2189_v23, %v5051_v35  ;;  %v2418_v8 = vsel %vm86_vm1, %v2048_v27, 0.0  ;;  %v2424_v62 = vsel %vm86_vm1, %v2050_v4, 0.0  ;;  %v5618_v63 = vld [vmem:[#allocation17_spill] sm:$0xff] }
 0x441   :  { %vm1835_vm12 = vcmp.eq.s32.totalorder %v4137_v12, %v5618_v63 }
 0x442   :  { %v2818_v49 = vsel %vm5611_vm0, %v2817_v15, %v2813_v34  ;;  %2404 = vadd.xlane.f32.xlu1 %v2403_v10  ;;  %2407 = vadd.xlane.f32.xlu0 %v2406_v61  ;;  %vm1833_vm0 = vcmp.eq.s32.totalorder %v4137_v12, %v5616_v52  ;;  %v5619_v34 = vld [vmem:[#allocation18_spill] sm:$0xff] }
 0x443   :  { %v2198_v51 = vpop.xlane.xlu1 %2197  ;;  %v2823_v57 = vsel %vm2660_vm4, %v2822_v56, %v2818_v49  ;;  %v2195_v54 = vpop.xlane.xlu0 %2194  ;;  %v2051_v3 = vsel %vm1833_vm0, %v5232_v60, 0.0  ;;  %vm5622_vm0 = vcmask 654912  }
 0x444   :  { %v2832_v45 = vrot.slane %v2198_v51, %v5070_v9  ;;  %v2827_v44 = vrot.slane %v2195_v54, %v5073_v42  ;;  %v2427_v49 = vsel %vm86_vm1, %v2051_v3, 0.0 }
 0x446   :  { %v2828_v11 = vsel %vm2667_vm8, %v2827_v44, %v2823_v57  ;;  %2410 = vadd.xlane.f32.xlu1 %v2409_v31  ;;  %2413 = vadd.xlane.f32.xlu0 %v2412_v37 }
 0x447   :  { %v2833_v20 = vsel %vm2674_vm6, %v2832_v45, %v2828_v11  ;;  %v2252_v1 = vpop.xlane.xlu1 %2251  ;;  %v2249_v43 = vpop.xlane.xlu0 %2248 }
 0x448   :  { %v5303_v53 = vsel %vm3231_vm11, %v2833_v20, %v5200_v55  ;;  %v2920_v14 = vrot.slane %v2252_v1, %v4896_v36  ;;  %v2916_v5 = vrot.slane %v2249_v43, %v4893_v18  ;;  %v5617_v55 = vld [vmem:[#allocation44_spill] sm:$0xff]  ;;  %vm1836_vm11 = vcmp.eq.s32.totalorder %v4137_v12, %v5619_v34 }
 0x449   :  { %vm1834_vm2 = vcmp.eq.s32.totalorder %v4137_v12, %v5617_v55  ;;  %v2054_v7 = vsel %vm1836_vm11, %v5232_v60, 0.0  ;;  %v2053_v12 = vsel %vm1835_vm12, %v5232_v60, 0.0  ;;  %vm5625_vm12 = vcmask 851712   ;;  %vm5626_vm11 = vmmov %vm5620_vm3 }
 0x44a   :  { %v2921_v46 = vsel %vm2576_vm5, %v2920_v14, %v2916_v5  ;;  %2416 = vadd.xlane.f32.xlu1 %v2415_v0  ;;  %2419 = vadd.xlane.f32.xlu0 %v2418_v8  ;;  %v2052_v16 = vsel %vm1834_vm2, %v5232_v60, 0.0  ;;  %v2436_v44 = vsel %vm86_vm1, %v2054_v7, 0.0  ;;  %v2433_v31 = vsel %vm86_vm1, %v2053_v12, 0.0 }
 0x44b   :  { %v2258_v26 = vpop.xlane.xlu1 %2257  ;;  %v2255_v58 = vpop.xlane.xlu0 %2254  ;;  %v2430_v32 = vsel %vm86_vm1, %v2052_v16, 0.0  ;;  %vm5623_vm1 = vcmask 720512   ;;  %vm5624_vm2 = vcmask 786112  }
 0x44c   :  { %v2930_v48 = vrot.slane %v2258_v26, %v4914_v40  ;;  %v2925_v13 = vrot.slane %v2255_v58, %v4920_v2 }
 0x44e   :  { %v2926_v33 = vsel %vm2583_vm9, %v2925_v13, %v2921_v46  ;;  %2422 = vadd.xlane.f32.xlu1 %v2421_v50  ;;  %2425 = vadd.xlane.f32.xlu0 %v2424_v62 }
 0x44f   :  { %v2264_v23 = vpop.xlane.xlu1 %2263  ;;  %v2931_v56 = vsel %vm2590_vm10, %v2930_v48, %v2926_v33  ;;  %v2261_v15 = vpop.xlane.xlu0 %2260 }
 0x450   :  { %v2940_v10 = vrot.slane %v2264_v23, %v4941_v41  ;;  %v2935_v61 = vrot.slane %v2261_v15, %v4947_v17 }
 0x452   :  { %v2936_v59 = vsel %vm2597_vm13, %v2935_v61, %v2931_v56  ;;  %2428 = vadd.xlane.f32.xlu1 %v2427_v49  ;;  %2431 = vadd.xlane.f32.xlu0 %v2430_v32 }
 0x453   :  { %v2270_v29 = vpop.xlane.xlu1 %2269  ;;  %v2941_v51 = vsel %vm2604_vm14, %v2940_v10, %v2936_v59  ;;  %v2267_v57 = vpop.xlane.xlu0 %2266 }
 0x454   :  { %v2950_v54 = vrot.slane %v2270_v29, %v4967_v25  ;;  %v2945_v45 = vrot.slane %v2267_v57, %v4973_v6 }
 0x456   :  { %v2946_v37 = vsel %vm2611_vm15, %v2945_v45, %v2941_v51  ;;  %2437 = vadd.xlane.f32.xlu1 %v2436_v44  ;;  %2434 = vadd.xlane.f32.xlu0 %v2433_v31 }
 0x457   :  { %v2276_v11 = vpop.xlane.xlu1 %2275  ;;  %v2951_v28 = vsel %vm5620_vm3, %v2950_v54, %v2946_v37  ;;  %v2273_v60 = vpop.xlane.xlu0 %2272  ;;  %vm5627_vm3 = vmmov %vm5621_vm7 }
 0x458   :  { %v2960_v27 = vrot.slane %v2276_v11, %v4995_v22  ;;  %v2955_v47 = vrot.slane %v2273_v60, %v5001_v30 }
 0x45a   :  { %v2956_v21 = vsel %vm5621_vm7, %v2955_v47, %v2951_v28  ;;  %vm5628_vm7 = vmmov %vm5622_vm0 }
 0x45b   :  { %v2282_v20 = vpop.xlane.xlu1 %2281  ;;  %v2961_v1 = vsel %vm5622_vm0, %v2960_v27, %v2956_v21  ;;  %v2279_v43 = vpop.xlane.xlu0 %2278  ;;  %vm5629_vm0 = vmmov %vm5623_vm1 }
 0x45c   :  { %v2970_v14 = vrot.slane %v2282_v20, %v5022_v39  ;;  %v2965_v5 = vrot.slane %v2279_v43, %v5028_v24 }
 0x45e   :  { %v2966_v0 = vsel %vm5623_vm1, %v2965_v5, %v2961_v1  ;;  %vm5630_vm1 = vmmov %vm5624_vm2 }
 0x45f   :  { %v2288_v8 = vpop.xlane.xlu1 %2287  ;;  %v2971_v46 = vsel %vm5624_vm2, %v2970_v14, %v2966_v0  ;;  %v2285_v38 = vpop.xlane.xlu0 %2284  ;;  %vm5631_vm2 = vmmov %vm5625_vm12 }
 0x460   :  { %v2980_v4 = vrot.slane %v2288_v8, %v5045_v19  ;;  %v2975_v52 = vrot.slane %v2285_v38, %v5051_v35 }
 0x462   :  { %v2976_v55 = vsel %vm5625_vm12, %v2975_v52, %v2971_v46  ;;  %vm3233_vm12 = vcmask 1043459  }
 0x463   :  { %v2294_v26 = vpop.xlane.xlu1 %2293  ;;  %v2981_v58 = vsel %vm2660_vm4, %v2980_v4, %v2976_v55  ;;  %v2291_v48 = vpop.xlane.xlu0 %2290 }
 0x464   :  { %v2990_v13 = vrot.slane %v2294_v26, %v5070_v9  ;;  %v2985_v50 = vrot.slane %v2291_v48, %v5073_v42 }
 0x466   :  { %v2986_v62 = vsel %vm2667_vm8, %v2985_v50, %v2981_v58 }
 0x467   :  { %v2991_v33 = vsel %vm2674_vm6, %v2990_v13, %v2986_v62  ;;  %v2204_v3 = vpop.xlane.xlu1 %2203  ;;  %v2201_v16 = vpop.xlane.xlu0 %2200 }
 0x468   :  { %v2841_v63 = vrot.slane %v2204_v3, %v4896_v36  ;;  %v2837_v34 = vrot.slane %v2201_v16, %v4893_v18 }
 0x46a   :  { %v2842_v23 = vsel %vm2576_vm5, %v2841_v63, %v2837_v34 }
 0x46b   :  { %v2210_v56 = vpop.xlane.xlu1 %2209  ;;  %v2207_v15 = vpop.xlane.xlu0 %2206 }
 0x46c   :  { %v2851_v10 = vrot.slane %v2210_v56, %v4914_v40  ;;  %v2846_v61 = vrot.slane %v2207_v15, %v4920_v2 }
 0x46e   :  { %v2847_v49 = vsel %vm2583_vm9, %v2846_v61, %v2842_v23 }
 0x46f   :  { %v2216_v32 = vpop.xlane.xlu1 %2215  ;;  %v2852_v59 = vsel %vm2590_vm10, %v2851_v10, %v2847_v49  ;;  %v2213_v7 = vpop.xlane.xlu0 %2212 }
 0x470   :  { %v2861_v12 = vrot.slane %v2216_v32, %v4941_v41  ;;  %v2856_v29 = vrot.slane %v2213_v7, %v4947_v17 }
 0x472   :  { %v2857_v51 = vsel %vm2597_vm13, %v2856_v29, %v2852_v59 }
 0x473   :  { %v2222_v57 = vpop.xlane.xlu1 %2221  ;;  %v2862_v54 = vsel %vm2604_vm14, %v2861_v12, %v2857_v51  ;;  %v2219_v45 = vpop.xlane.xlu0 %2218 }
 0x474   :  { %v2871_v44 = vrot.slane %v2222_v57, %v4967_v25  ;;  %v2866_v31 = vrot.slane %v2219_v45, %v4973_v6 }
 0x476   :  { %v2867_v37 = vsel %vm2611_vm15, %v2866_v31, %v2862_v54 }
 0x477   :  { %v2228_v11 = vpop.xlane.xlu1 %2227  ;;  %v2872_v28 = vsel %vm5626_vm11, %v2871_v44, %v2867_v37  ;;  %v2225_v60 = vpop.xlane.xlu0 %2224  ;;  %vm3235_vm11 = vcmask 1044484  }
 0x478   :  { %v2881_v27 = vrot.slane %v2228_v11, %v4995_v22  ;;  %v2876_v47 = vrot.slane %v2225_v60, %v5001_v30 }
 0x47a   :  { %v2877_v21 = vsel %vm5627_vm3, %v2876_v47, %v2872_v28  ;;  %vm5632_vm3 = vcmask 523712  }
 0x47b   :  { %v2234_v20 = vpop.xlane.xlu1 %2233  ;;  %v2882_v1 = vsel %vm5628_vm7, %v2881_v27, %v2877_v21  ;;  %v2231_v43 = vpop.xlane.xlu0 %2230  ;;  %vm5633_vm7 = vmmov %vm5632_vm3 }
 0x47c   :  { %v2891_v14 = vrot.slane %v2234_v20, %v5022_v39  ;;  %v2886_v5 = vrot.slane %v2231_v43, %v5028_v24 }
 0x47e   :  { %v2887_v0 = vsel %vm5629_vm0, %v2886_v5, %v2882_v1  ;;  %vm5634_vm0 = vcmask 589312  }
 0x47f   :  { %v2240_v8 = vpop.xlane.xlu1 %2239  ;;  %v2892_v46 = vsel %vm5630_vm1, %v2891_v14, %v2887_v0  ;;  %v2237_v38 = vpop.xlane.xlu0 %2236  ;;  %vm5635_vm1 = vmmov %vm5634_vm0 }
 0x480   :  { %v2901_v4 = vrot.slane %v2240_v8, %v5045_v19  ;;  %v2896_v52 = vrot.slane %v2237_v38, %v5051_v35 }
 0x482   :  { %v2897_v55 = vsel %vm5631_vm2, %v2896_v52, %v2892_v46  ;;  %vm5636_vm2 = vcmask 654912  }
 0x483   :  { %v2246_v26 = vpop.xlane.xlu1 %2245  ;;  %v2902_v58 = vsel %vm2660_vm4, %v2901_v4, %v2897_v55  ;;  %v2243_v48 = vpop.xlane.xlu0 %2242 }
 0x484   :  { %v2911_v13 = vrot.slane %v2246_v26, %v5070_v9  ;;  %v2906_v50 = vrot.slane %v2243_v48, %v5073_v42 }
 0x486   :  { %v2907_v62 = vsel %vm2667_vm8, %v2906_v50, %v2902_v58 }
 0x487   :  { %v2912_v3 = vsel %vm2674_vm6, %v2911_v13, %v2907_v62  ;;  %v2300_v16 = vpop.xlane.xlu1 %2299  ;;  %v2297_v63 = vpop.xlane.xlu0 %2296 }
 0x488   :  { %v3234_v34 = vsel %vm3233_vm12, %v2912_v3, %v5303_v53  ;;  %v2999_v23 = vrot.slane %v2300_v16, %v4896_v36  ;;  %v2995_v56 = vrot.slane %v2297_v63, %v4893_v18  ;;  %vm5637_vm12 = vmmov %vm5636_vm2 }
 0x489   :  { %v5392_v15 = vsel %vm3235_vm11, %v2991_v33, %v3234_v34  ;;  %vm5638_vm11 = vcmask 720512  }
 0x48a   :  { %v3000_v10 = vsel %vm2576_vm5, %v2999_v23, %v2995_v56 }
 0x48b   :  { %v2345_v61 = vpop.xlane.xlu1 %2344  ;;  %v2303_v49 = vpop.xlane.xlu0 %2302 }
 0x48c   :  { %v3004_v32 = vrot.slane %v2303_v49, %v4920_v2  ;;  %v3074_v29 = vrot.slane %v2345_v61, %v4893_v18 }
 0x48e   :  { %v3005_v59 = vsel %vm2583_vm9, %v3004_v32, %v3000_v10 }
 0x48f   :  { %v2306_v7 = vpop.xlane.xlu1 %2305  ;;  %v2348_v12 = vpop.xlane.xlu0 %2347 }
 0x490   :  { %v3009_v53 = vrot.slane %v2306_v7, %v4914_v40  ;;  %v3078_v51 = vrot.slane %v2348_v12, %v4896_v36 }
 0x492   :  { %v3010_v57 = vsel %vm2590_vm10, %v3009_v53, %v3005_v59  ;;  %v3079_v33 = vsel %vm2576_vm5, %v3078_v51, %v3074_v29 }
 0x493   :  { %v2309_v54 = vpop.xlane.xlu1 %2308  ;;  %v2351_v45 = vpop.xlane.xlu0 %2350 }
 0x494   :  { %v3014_v44 = vrot.slane %v2309_v54, %v4947_v17  ;;  %v3083_v31 = vrot.slane %v2351_v45, %v4920_v2 }
 0x496   :  { %v3015_v37 = vsel %vm2597_vm13, %v3014_v44, %v3010_v57  ;;  %v3084_v11 = vsel %vm2583_vm9, %v3083_v31, %v3079_v33 }
 0x497   :  { %v2357_v28 = vpop.xlane.xlu1 %2356  ;;  %v2354_v60 = vpop.xlane.xlu0 %2353 }
 0x498   :  { %v3093_v27 = vrot.slane %v2357_v28, %v4947_v17  ;;  %v3088_v47 = vrot.slane %v2354_v60, %v4914_v40 }
 0x49a   :  { %v3089_v21 = vsel %vm2590_vm10, %v3088_v47, %v3084_v11 }
 0x49b   :  { %v2315_v20 = vpop.xlane.xlu1 %2314  ;;  %v2312_v1 = vpop.xlane.xlu0 %2311  ;;  %v3094_v43 = vsel %vm2597_vm13, %v3093_v27, %v3089_v21 }
 0x49c   :  { %v3019_v55 = vrot.slane %v2312_v1, %v4941_v41  ;;  %v3024_v13 = vrot.slane %v2315_v20, %v4973_v6 }
 0x49e   :  { %v3020_v62 = vsel %vm2604_vm14, %v3019_v55, %v3015_v37 }
 0x49f   :  { %v2363_v14 = vpop.xlane.xlu1 %2362  ;;  %v2360_v5 = vpop.xlane.xlu0 %2359  ;;  %v3025_v10 = vsel %vm2611_vm15, %v3024_v13, %v3020_v62 }
 0x4a0   :  { %v3098_v26 = vrot.slane %v2360_v5, %v4941_v41  ;;  %v3103_v50 = vrot.slane %v2363_v14, %v4973_v6 }
 0x4a2   :  { %v3099_v3 = vsel %vm2604_vm14, %v3098_v26, %v3094_v43 }
 0x4a3   :  { %v2321_v0 = vpop.xlane.xlu1 %2320  ;;  %v2318_v8 = vpop.xlane.xlu0 %2317  ;;  %v3104_v49 = vsel %vm2611_vm15, %v3103_v50, %v3099_v3 }
 0x4a4   :  { %v3029_v16 = vrot.slane %v2318_v8, %v4967_v25  ;;  %v3034_v56 = vrot.slane %v2321_v0, %v5001_v30 }
 0x4a6   :  { %v3030_v32 = vsel %vm5632_vm3, %v3029_v16, %v3025_v10  ;;  %vm5639_vm3 = vmmov %vm5638_vm11 }
 0x4a7   :  { %v2369_v46 = vpop.xlane.xlu1 %2368  ;;  %v2366_v38 = vpop.xlane.xlu0 %2365  ;;  %v3035_v57 = vsel %vm5634_vm0, %v3034_v56, %v3030_v32 }
 0x4a8   :  { %v3108_v63 = vrot.slane %v2366_v38, %v4967_v25  ;;  %v3113_v61 = vrot.slane %v2369_v46, %v5001_v30 }
 0x4aa   :  { %v3109_v59 = vsel %vm5633_vm7, %v3108_v63, %v3104_v49  ;;  %vm5640_vm7 = vcmask 786112  }
 0x4ab   :  { %v2327_v4 = vpop.xlane.xlu1 %2326  ;;  %v2324_v52 = vpop.xlane.xlu0 %2323  ;;  %v3114_v54 = vsel %vm5635_vm1, %v3113_v61, %v3109_v59  ;;  %vm5641_vm0 = vmmov %vm5640_vm7  ;;  %vm5642_vm1 = vcmask 851712  }
 0x4ac   :  { %v3039_v7 = vrot.slane %v2324_v52, %v4995_v22  ;;  %v3044_v51 = vrot.slane %v2327_v4, %v5028_v24 }
 0x4ae   :  { %v3040_v45 = vsel %vm5636_vm2, %v3039_v7, %v3035_v57  ;;  %vm5643_vm2 = vmmov %vm5642_vm1 }
 0x4af   :  { %v2375_v58 = vpop.xlane.xlu1 %2374  ;;  %v2372_v48 = vpop.xlane.xlu0 %2371  ;;  %v3045_v27 = vsel %vm5638_vm11, %v3044_v51, %v3040_v45  ;;  %vm3239_vm11 = vcmask 1046534  }
 0x4b0   :  { %v3118_v12 = vrot.slane %v2372_v48, %v4995_v22  ;;  %v3123_v33 = vrot.slane %v2375_v58, %v5028_v24 }
 0x4b2   :  { %v3119_v44 = vsel %vm5637_vm12, %v3118_v12, %v3114_v54  ;;  %vm3237_vm12 = vcmask 1045509  }
 0x4b3   :  { %v2333_v34 = vpop.xlane.xlu1 %2332  ;;  %v2330_v23 = vpop.xlane.xlu0 %2329  ;;  %v3124_v21 = vsel %vm5639_vm3, %v3123_v33, %v3119_v44 }
 0x4b4   :  { %v3049_v31 = vrot.slane %v2330_v23, %v5022_v39  ;;  %v3054_v60 = vrot.slane %v2333_v34, %v5051_v35 }
 0x4b6   :  { %v3050_v20 = vsel %vm5640_vm7, %v3049_v31, %v3045_v27 }
 0x4b7   :  { %v2381_v29 = vpop.xlane.xlu1 %2380  ;;  %v2378_v53 = vpop.xlane.xlu0 %2377  ;;  %v3055_v46 = vsel %vm5642_vm1, %v3054_v60, %v3050_v20 }
 0x4b8   :  { %v3128_v37 = vrot.slane %v2378_v53, %v5022_v39  ;;  %v3133_v47 = vrot.slane %v2381_v29, %v5051_v35 }
 0x4ba   :  { %v3129_v1 = vsel %vm5641_vm0, %v3128_v37, %v3124_v21 }
 0x4bb   :  { %v2339_v11 = vpop.xlane.xlu1 %2338  ;;  %v2336_v28 = vpop.xlane.xlu0 %2335  ;;  %v3134_v4 = vsel %vm5643_vm2, %v3133_v47, %v3129_v1 }
 0x4bc   :  { %v3059_v43 = vrot.slane %v2336_v28, %v5045_v19  ;;  %v3064_v8 = vrot.slane %v2339_v11, %v5073_v42 }
 0x4be   :  { %v3060_v52 = vsel %vm2660_vm4, %v3059_v43, %v3055_v46 }
 0x4bf   :  { %v2387_v14 = vpop.xlane.xlu1 %2386  ;;  %v2384_v5 = vpop.xlane.xlu0 %2383  ;;  %v3065_v62 = vsel %vm2667_vm8, %v3064_v8, %v3060_v52 }
 0x4c0   :  { %v3138_v0 = vrot.slane %v2384_v5, %v5045_v19  ;;  %v3143_v38 = vrot.slane %v2387_v14, %v5073_v42 }
 0x4c2   :  { %v3139_v55 = vsel %vm2660_vm4, %v3138_v0, %v3134_v4 }
 0x4c3   :  { %v2390_v26 = vpop.xlane.xlu1 %2389  ;;  %v2342_v58 = vpop.xlane.xlu0 %2341  ;;  %v3144_v50 = vsel %vm2667_vm8, %v3143_v38, %v3139_v55 }
 0x4c4   :  { %v3148_v48 = vrot.slane %v2390_v26, %v5070_v9  ;;  %v3069_v13 = vrot.slane %v2342_v58, %v5070_v9 }
 0x4c6   :  { %v3149_v3 = vsel %vm2674_vm6, %v3148_v48, %v3144_v50  ;;  %v3070_v16 = vsel %vm2674_vm6, %v3069_v13, %v3065_v62 }
 0x4c7   :  { %v2393_v63 = vpop.xlane.xlu1 %2392  ;;  %v2396_v34 = vpop.xlane.xlu0 %2395  ;;  %v3238_v23 = vsel %vm3237_vm12, %v3070_v16, %v5392_v15 }
 0x4c8   :  { %v3240_v56 = vsel %vm3239_vm11, %v3149_v3, %v3238_v23  ;;  %v3153_v10 = vrot.slane %v2393_v63, %v4893_v18  ;;  %v3157_v61 = vrot.slane %v2396_v34, %v4896_v36 }
 0x4ca   :  { %v3158_v7 = vsel %vm2576_vm5, %v3157_v61, %v3153_v10  ;;  %vm5644_vm5 = vcmask 523712  }
 0x4cb   :  { %v2399_v49 = vpop.xlane.xlu1 %2398  ;;  %v2402_v32 = vpop.xlane.xlu0 %2401 }
 0x4cc   :  { %v3162_v59 = vrot.slane %v2399_v49, %v4920_v2  ;;  %v3167_v12 = vrot.slane %v2402_v32, %v4914_v40 }
 0x4ce   :  { %v3163_v29 = vsel %vm2583_vm9, %v3162_v59, %v3158_v7  ;;  %vm5645_vm9 = vcmask 589312  }
 0x4cf   :  { %v2405_v53 = vpop.xlane.xlu1 %2404  ;;  %v2408_v51 = vpop.xlane.xlu0 %2407  ;;  %v3168_v15 = vsel %vm2590_vm10, %v3167_v12, %v3163_v29  ;;  %vm5646_vm10 = vcmask 654912  }
 0x4d0   :  { %v3172_v57 = vrot.slane %v2405_v53, %v4947_v17  ;;  %v3177_v18 = vrot.slane %v2408_v51, %v4941_v41 }
 0x4d2   :  { %v3173_v36 = vsel %vm2597_vm13, %v3172_v57, %v3168_v15  ;;  %vm5647_vm13 = vmmov %vm5639_vm3  ;;  %vm3241_vm3 = vcmask 1047559  }
 0x4d3   :  { %v2411_v33 = vpop.xlane.xlu1 %2410  ;;  %v2414_v54 = vpop.xlane.xlu0 %2413  ;;  %v3178_v45 = vsel %vm2604_vm14, %v3177_v18, %v3173_v36  ;;  %vm5648_vm14 = vmmov %vm5641_vm0 }
 0x4d4   :  { %v3182_v2 = vrot.slane %v2411_v33, %v4973_v6  ;;  %v3187_v40 = vrot.slane %v2414_v54, %v4967_v25 }
 0x4d6   :  { %v3183_v44 = vsel %vm2611_vm15, %v3182_v2, %v3178_v45  ;;  %vm5649_vm15 = vmmov %vm5642_vm1 }
 0x4d7   :  { %v2417_v31 = vpop.xlane.xlu1 %2416  ;;  %v2420_v37 = vpop.xlane.xlu0 %2419  ;;  %v3188_v11 = vsel %vm5644_vm5, %v3187_v40, %v3183_v44 }
 0x4d8   :  { %v3192_v17 = vrot.slane %v2417_v31, %v5001_v30  ;;  %v3197_v41 = vrot.slane %v2420_v37, %v4995_v22 }
 0x4da   :  { %v3193_v28 = vsel %vm5645_vm9, %v3192_v17, %v3188_v11 }
 0x4db   :  { %v2423_v60 = vpop.xlane.xlu1 %2422  ;;  %v2426_v27 = vpop.xlane.xlu0 %2425  ;;  %v3198_v47 = vsel %vm5646_vm10, %v3197_v41, %v3193_v28 }
 0x4dc   :  { %v3202_v6 = vrot.slane %v2423_v60, %v5028_v24  ;;  %v3207_v25 = vrot.slane %v2426_v27, %v5022_v39 }
 0x4de   :  { %v3203_v21 = vsel %vm5647_vm13, %v3202_v6, %v3198_v47 }
 0x4df   :  { %v2429_v20 = vpop.xlane.xlu1 %2428  ;;  %v2432_v1 = vpop.xlane.xlu0 %2431  ;;  %v3208_v43 = vsel %vm5648_vm14, %v3207_v25, %v3203_v21 }
 0x4e0   :  { %v3212_v30 = vrot.slane %v2429_v20, %v5051_v35  ;;  %v3217_v22 = vrot.slane %v2432_v1, %v5045_v19 }
 0x4e2   :  { %v3213_v14 = vsel %vm5649_vm15, %v3212_v30, %v3208_v43 }
 0x4e3   :  { %v2438_v5 = vpop.xlane.xlu1 %2437  ;;  %v2435_v0 = vpop.xlane.xlu0 %2434  ;;  %v3218_v39 = vsel %vm2660_vm4, %v3217_v22, %v3213_v14 }
 0x4e4   :  { %v3227_v24 = vrot.slane %v2438_v5, %v5070_v9  ;;  %v3222_v8 = vrot.slane %v2435_v0, %v5073_v42 }
 0x4e6   :  { %v3223_v46 = vsel %vm2667_vm8, %v3222_v8, %v3218_v39 }
 0x4e7   :  { %v3228_v35 = vsel %vm2674_vm6, %v3227_v24, %v3223_v46 }
 0x4e8   :  { %v3242_v38 = vsel %vm3241_vm3, %v3228_v35, %v3240_v56 }
 0x4e9   :  { %3244 = vst [vmem:[#allocation10] sm:$0xff] %v3242_v38 }
 0x4ea   :  { %3877 = shalt.err (!%p3874_p8)
}
 0x4eb   :  { %s3878_s13 = scalar_lea.hbm %s5502_s4, 128 }
 0x4ec   :  { %p3879_p9 = scmp.ne.s32.totalorder %s5502_s4, %s3878_s13  ;;  %p3882_p10 = scmp.lt.u32.totalorder %s3878_s13, %s5502_s4 }
 0x4ee   :  { %p3884_p11 = pnand %p3882_p10, %p3879_p9 }
 0x4f0   :  { %3887 = shalt.err (!%p3884_p11)
}
 0x4f1   :  { %3254 = dma.vmem_to_hbm [thread:$0]  %s3252_s10, 128, %s5502_s4, [#allocation4]  }
 0x4f2   :  { %3894 = dma.done.wait [#allocation4], 128  }
 0x4f3   :  { %3895 = vsyncadd [#allocation4], 4294967168 }
 0x4f4   :  { %3258 = vsyncpa [#allocation3], 1 }
 0x4f5   :  { %3259 = vsyncpa [#allocation6], 1 }
 0x4f6   :  { %3260 = vsyncpa [#allocation9], 1 }
 0x4f7   :  { %3261 = vsyncpa [#allocation4], 1 }

</bundles_post_ra>
